<compile_context>
chip_gen: v7x
topology: tpu7x:2x2x1
jax: 0.10.0
libtpu: 0.0.40
codegen_flags: <defaults>
</compile_context>

<pallas_src>
import functools

import numpy as np
import jax
import jax.numpy as jnp
from jax.experimental import pallas as pl
from jax.experimental.pallas import tpu as pltpu


# ---------------------------------------------------------------------------
# Small helpers
# ---------------------------------------------------------------------------
def _choose_tile(n):
    """Largest lane-friendly tile that divides N (keeps the per-tile working set
    small enough to double-buffer well inside v7x's 64 MiB VMEM)."""
    for cand in (1024, 512, 256, 128):
        if n % cand == 0 and n > cand:
            return cand
    return n


def _cosine_max_sim_ref(data, m):
    # TODO(synk): calucate_sim is undefined in the reference source; cosine-max stand-in.
    dn = data * jax.lax.rsqrt(jnp.sum(data * data, axis=1, keepdims=True) + 1e-12)
    mn = m * jax.lax.rsqrt(jnp.sum(m * m, axis=1, keepdims=True) + 1e-12)
    return jnp.max(dn @ mn.T, axis=1)


def _emb_standin_ref(data, m):
    # TODO(synk): calucate_emb is undefined in the reference source; attention-readout stand-in.
    scale = float(m.shape[-1]) ** -0.5
    logits = jnp.dot(data, m.T) * scale
    attn = jax.nn.softmax(logits, axis=-1)
    out_ebs = jnp.dot(attn, m)
    result_loss = jnp.mean((out_ebs - data) ** 2)
    zloss = jnp.mean(jax.nn.logsumexp(logits, axis=-1) ** 2)
    return out_ebs, result_loss, zloss


def _prepare_weights(params, heads, dh):
    """Rearrange torch-layout weights into head-batched bf16 MXU layouts, and pad the
    per-layer stacks by one (dummy) layer so the sim/emb grid phase can keep a plain
    (l, 0, ...) index map."""
    kv_dim = heads * dh
    x_dim = params["to_kv_w"].shape[0]
    num_layers, m_dim, _ = params["to_q_w"].shape

    kvw = params["to_kv_w"].astype(jnp.bfloat16)                              # (X_dim, 2*kv)
    kw = kvw[:, :kv_dim].reshape(x_dim, heads, dh).transpose(1, 0, 2)         # (h, X_dim, dh)
    vw = kvw[:, kv_dim:].reshape(x_dim, heads, dh).transpose(1, 0, 2)         # (h, X_dim, dh)
    qw = params["to_q_w"].astype(jnp.bfloat16).reshape(
        num_layers, m_dim, heads, dh).transpose(0, 2, 1, 3)                   # (L, h, M_dim, dh)
    ow = params["mutl_w"].astype(jnp.bfloat16).reshape(
        num_layers, heads, dh, m_dim)                                         # (L, h, dh, M_dim)
    ob = params["mutl_b"]                                                     # (L, 1, M_dim)

    pad = lambda w: jnp.concatenate([w, w[-1:]], axis=0)
    return kw, vw, pad(qw), pad(ow), pad(ob)


# ---------------------------------------------------------------------------
# Fused kernel: cross-attention layer stack + sim recompute + emb readout.
# grid = (num_layers + 1, N // tn); both axes are sequential ("arbitrary"):
# the layer axis carries M, the N axis is the online-softmax reduction.
# ---------------------------------------------------------------------------
def _landmark_fused_kernel(
    # inputs
    m_ref, mask_ref, data_ref, kw_ref, vw_ref, qw_ref, ow_ref, ob_ref,
    # outputs
    m_out_ref, sim_ref, emb_ref, rloss_ref, zloss_ref,
    # scratch
    m_sc, q_sc, mi_sc, li_sc, acc_sc, mse_sc, zsum_sc,
    *, num_layers, heads, dh, n_total, scale, eps):
    l = pl.program_id(0)
    t = pl.program_id(1)
    nt = pl.num_programs(1)
    mem, m_dim = m_sc.shape
    tn = data_ref.shape[0]

    # Initialize the carried memory M (= Memory.clone()) at the first grid step.
    @pl.when((l == 0) & (t == 0))
    def _init_m():
        m_sc[...] = m_ref[...]

    # ------------------------- attention phases (l < L) -------------------------
    @pl.when(l < num_layers)
    def _attention_phase():
        # Per-layer prologue: q projection (head-batched) + online-softmax state reset.
        @pl.when(t == 0)
        def _start_layer():
            m_b = jnp.broadcast_to(m_sc[...].astype(jnp.bfloat16)[None],
                                   (heads, mem, m_dim))
            q = jnp.einsum('hmk,hkd->hmd', m_b, qw_ref[...],
                           preferred_element_type=jnp.float32)          # (h, mem, dh)
            q_sc[...] = q.astype(jnp.bfloat16)
            mi_sc[...] = jnp.full(mi_sc.shape, -jnp.inf, jnp.float32)
            li_sc[...] = jnp.zeros(li_sc.shape, jnp.float32)
            acc_sc[...] = jnp.zeros(acc_sc.shape, jnp.float32)

        # Masked landmark features built in-kernel (X[top] = data[top], 0 elsewhere).
        x = (data_ref[...] * mask_ref[...]).astype(jnp.bfloat16)        # (tn, X_dim)
        x_b = jnp.broadcast_to(x[None], (heads, tn, x.shape[1]))        # (h, tn, X_dim)
        k = jnp.einsum('hnk,hkd->hnd', x_b, kw_ref[...],
                       preferred_element_type=jnp.float32).astype(jnp.bfloat16)
        v = jnp.einsum('hnk,hkd->hnd', x_b, vw_ref[...],
                       preferred_element_type=jnp.float32).astype(jnp.bfloat16)

        # Head-batched scores + flash-style online softmax (f32 math).
        s = jnp.einsum('hmd,hnd->hmn', q_sc[...], k,
                       preferred_element_type=jnp.float32) * scale      # (h, mem, tn)
        m_prev = mi_sc[...]
        m_new = jnp.maximum(m_prev, jnp.max(s, axis=-1, keepdims=True))
        alpha = jnp.exp(m_prev - m_new)
        p = jnp.exp(s - m_new)
        li_sc[...] = alpha * li_sc[...] + jnp.sum(p, axis=-1, keepdims=True)
        acc_sc[...] = alpha * acc_sc[...] + jnp.einsum(
            'hmn,hnd->hmd', p.astype(jnp.bfloat16), v,
            preferred_element_type=jnp.float32)
        mi_sc[...] = m_new

        # Per-layer epilogue: output projection, residual, post-norm layer_norm.
        @pl.when(t == nt - 1)
        def _finish_layer():
            attn = acc_sc[...] * pl.reciprocal(li_sc[...], approx=True)  # (h, mem, dh)
            out_h = jnp.einsum('hmd,hdo->hmo', attn.astype(jnp.bfloat16), ow_ref[...],
                               preferred_element_type=jnp.float32)       # (h, mem, M_dim)
            out = jnp.sum(out_h, axis=0) + ob_ref[...] + m_sc[...]       # mutl_heads + residual
            mu = jnp.mean(out, axis=-1, keepdims=True)                   # F.layer_norm (no affine)
            var = jnp.mean((out - mu) * (out - mu), axis=-1, keepdims=True)
            m_sc[...] = (out - mu) * jax.lax.rsqrt(var + eps)

    # ---------------- final phase (l == L): sim recompute + emb readout ----------------
    @pl.when(l == num_layers)
    def _sim_emb_phase():
        d = data_ref[...]                                                # (tn, X_dim) f32
        m_f = m_sc[...]                                                  # (mem, M_dim) f32

        # calucate_sim stand-in: max_j cos(data_i, M_j)  -> lane-dense (1, tn) output.
        dn = (d * jax.lax.rsqrt(jnp.sum(d * d, axis=-1, keepdims=True) + 1e-12)
              ).astype(jnp.bfloat16)
        mn = (m_f * jax.lax.rsqrt(jnp.sum(m_f * m_f, axis=-1, keepdims=True) + 1e-12)
              ).astype(jnp.bfloat16)
        cs = jax.lax.dot_general(mn, dn, (((1,), (1,)), ((), ())),
                                 preferred_element_type=jnp.float32)     # (mem, tn)
        sim_ref[...] = jnp.max(cs, axis=0, keepdims=True)                # (1, tn)

        # calucate_emb stand-in: attention readout + MSE / z-loss accumulation.
        emb_scale = float(m_dim) ** -0.5
        logits = jax.lax.dot_general(d.astype(jnp.bfloat16), m_f.astype(jnp.bfloat16),
                                     (((1,), (1,)), ((), ())),
                                     preferred_element_type=jnp.float32) * emb_scale  # (tn, mem)
        rmax = jnp.max(logits, axis=-1, keepdims=True)
        pe = jnp.exp(logits - rmax)
        den = jnp.sum(pe, axis=-1, keepdims=True)
        attn = pe * pl.reciprocal(den, approx=True)
        out_ebs = jnp.dot(attn.astype(jnp.bfloat16), m_f.astype(jnp.bfloat16),
                          preferred_element_type=jnp.float32)            # (tn, M_dim)
        emb_ref[...] = out_ebs
        lse = rmax + jnp.log(den)                                        # (tn, 1)

        @pl.when(t == 0)
        def _init_losses():
            mse_sc[...] = jnp.zeros(mse_sc.shape, jnp.float32)
            zsum_sc[...] = jnp.zeros(zsum_sc.shape, jnp.float32)

        err = out_ebs - d
        mse_sc[...] += jnp.sum(jnp.sum(err * err, axis=-1, keepdims=True),
                               axis=0, keepdims=True)
        zsum_sc[...] += jnp.sum(lse * lse, axis=0, keepdims=True)

        @pl.when(t == nt - 1)
        def _finalize():
            m_out_ref[...] = m_f
            rloss_ref[...] = mse_sc[...] * (1.0 / float(n_total * m_dim))
            zloss_ref[...] = zsum_sc[...] * (1.0 / float(n_total))


def cross_layers_fused(m, mask, data, kw, vw, qw, ow, ob, *,
                       num_layers, heads, dim_heads, tn):
    mem, m_dim = m.shape
    n, x_dim = data.shape
    assert n % tn == 0
    grid = (num_layers + 1, n // tn)

    kernel = functools.partial(
        _landmark_fused_kernel, num_layers=num_layers, heads=heads, dh=dim_heads,
        n_total=n, scale=float(dim_heads) ** -0.5, eps=1e-5)

    out_shape = (
        jax.ShapeDtypeStruct((mem, m_dim), jnp.float32),   # M_out (aliased with M)
        jax.ShapeDtypeStruct((1, n), jnp.float32),         # sim   (lane-dense)
        jax.ShapeDtypeStruct((n, m_dim), jnp.float32),     # out_ebs
        jax.ShapeDtypeStruct((1, 1), jnp.float32),         # result_loss
        jax.ShapeDtypeStruct((1, 1), jnp.float32),         # zloss
    )
    in_specs = [
        pl.BlockSpec((mem, m_dim), lambda l, t: (0, 0)),                 # M
        pl.BlockSpec((tn, 1), lambda l, t: (t, 0)),                      # selection mask
        pl.BlockSpec((tn, x_dim), lambda l, t: (t, 0)),                  # data tile
        pl.BlockSpec((heads, x_dim, dim_heads), lambda l, t: (0, 0, 0)), # to_kv (K half)
        pl.BlockSpec((heads, x_dim, dim_heads), lambda l, t: (0, 0, 0)), # to_kv (V half)
        pl.BlockSpec((None, heads, m_dim, dim_heads), lambda l, t: (l, 0, 0, 0)),  # to_q[l]
        pl.BlockSpec((None, heads, dim_heads, m_dim), lambda l, t: (l, 0, 0, 0)),  # mutl_w[l]
        pl.BlockSpec((None, 1, m_dim), lambda l, t: (l, 0, 0)),                    # mutl_b[l]
    ]
    out_specs = (
        pl.BlockSpec((mem, m_dim), lambda l, t: (0, 0)),
        pl.BlockSpec((1, tn), lambda l, t: (0, t)),
        pl.BlockSpec((tn, m_dim), lambda l, t: (t, 0)),
        pl.BlockSpec((1, 1), lambda l, t: (0, 0)),
        pl.BlockSpec((1, 1), lambda l, t: (0, 0)),
    )
    scratch_shapes = [
        pltpu.VMEM((mem, m_dim), jnp.float32),               # carried M
        pltpu.VMEM((heads, mem, dim_heads), jnp.bfloat16),   # per-layer Q
        pltpu.VMEM((heads, mem, 1), jnp.float32),            # online-softmax running max
        pltpu.VMEM((heads, mem, 1), jnp.float32),            # online-softmax denominator
        pltpu.VMEM((heads, mem, dim_heads), jnp.float32),    # attention accumulator
        pltpu.VMEM((1, 1), jnp.float32),                     # MSE accumulator
        pltpu.VMEM((1, 1), jnp.float32),                     # z-loss accumulator
    ]

    m_out, sim, out_ebs, rloss, zloss = pl.pallas_call(
        kernel,
        out_shape=out_shape,
        grid=grid,
        in_specs=in_specs,
        out_specs=out_specs,
        scratch_shapes=scratch_shapes,
        input_output_aliases={0: 0},   # reuse the M buffer across outer iterations
        compiler_params=pltpu.CompilerParams(
            dimension_semantics=("arbitrary", "arbitrary"),
            vmem_limit_bytes=32 * 1024 * 1024),
    )(m, mask, data, kw, vw, qw, ow, ob)
    return m_out, sim[0], out_ebs, rloss[0, 0], zloss[0, 0]


# ---------------------------------------------------------------------------
# Pure-JAX f32 reference of the cross-layer stack (for a one-shot sanity check).
# ---------------------------------------------------------------------------
def _cross_layers_ref(m, x, kvw, qw, ow, ob, heads, dh):
    kv_dim = heads * dh
    scale = float(dh) ** -0.5
    kv = x @ kvw
    k_all, v_all = kv[:, :kv_dim], kv[:, kv_dim:]
    for l in range(qw.shape[0]):
        q_all = m @ qw[l]
        outs = []
        for h in range(heads):
            sl = slice(h * dh, (h + 1) * dh)
            s = (q_all[:, sl] @ k_all[:, sl].T) * scale
            p = jax.nn.softmax(s, axis=-1)
            outs.append(p @ v_all[:, sl])
        att = jnp.concatenate(outs, axis=1)
        out = att @ ow[l] + ob[l] + m
        mu = out.mean(-1, keepdims=True)
        var = ((out - mu) ** 2).mean(-1, keepdims=True)
        m = (out - mu) * jax.lax.rsqrt(var + 1e-5)
    return m


# ---------------------------------------------------------------------------
# Parameter init (matches the torch module's used parameter set).
# ---------------------------------------------------------------------------
def init_params(key, args):
    x_dim = args.hidden_dim_GRU
    m_dim = args.M_dim_M
    inner = args.heads_M * args.inner_dim_M
    num_layers = args.cross_MLP_layers_M
    ks = jax.random.split(key, 5)

    def unif(k, shape, fan_in):
        lim = 1.0 / np.sqrt(fan_in)
        return jax.random.uniform(k, shape, jnp.float32, -lim, lim)

    return {
        "memory": jax.random.normal(ks[0], (args.memory_num, m_dim), jnp.float32),
        "to_kv_w": unif(ks[1], (x_dim, 2 * inner), x_dim),
        "to_q_w": unif(ks[2], (num_layers, m_dim, inner), m_dim),
        "mutl_w": unif(ks[3], (num_layers, inner, m_dim), inner),
        "mutl_b": unif(ks[4], (num_layers, 1, m_dim), inner),
    }


# ---------------------------------------------------------------------------
# LandmarkMarkMatch.forward
# ---------------------------------------------------------------------------
def landmark_mark_match_forward(params, data, istest, args):
    heads, dh = args.heads_M, args.inner_dim_M
    m = params["memory"]                                   # M = Memory.clone()
    n = data.shape[0]
    percent_count = int(n * args.percent_selected_M)
    tn = _choose_tile(n)

    sim_m = _cosine_max_sim_ref(data, m)                   # initial calucate_sim (tiny -> XLA)
    _, top_idx = jax.lax.top_k(sim_m, percent_count)

    if istest:
        out_ebs, result_loss, zloss = _emb_standin_ref(data, m)
        return sim_m, out_ebs, result_loss, zloss

    kw, vw, qw, ow, ob = _prepare_weights(params, heads, dh)
    out_ebs = result_loss = zloss = None
    for _ in range(args.layers_num_M):
        # X[top_idx] = data[top_idx] realized as an (N,1) 0/1 mask; the masked X is
        # built inside the kernel (no N x X_dim scatter / extra HBM round-trip).
        mask = jnp.zeros((n, 1), jnp.float32).at[top_idx].set(1.0)
        m, sim_m, out_ebs, result_loss, zloss = cross_layers_fused(
            m, mask, data, kw, vw, qw, ow, ob,
            num_layers=args.cross_MLP_layers_M, heads=heads, dim_heads=dh, tn=tn)
        _, top_idx = jax.lax.top_k(sim_m, percent_count)
    # emb/losses from the LAST outer iteration are computed from the final M.
    return sim_m, out_ebs, result_loss, zloss


# ---------------------------------------------------------------------------
if __name__ == "__main__":
    class Args:
        pass

    args = Args()
    args.hidden_dim_GRU = 32        # X_dim (== M_dim so the sim/emb stand-ins are well-defined)
    args.M_dim_M = 32               # M_dim
    args.heads_M = 2
    args.inner_dim_M = 16           # dim_heads -> inner_dim = kv_dim = 32
    args.memory_num = 8
    args.percent_selected_M = 0.5
    args.layers_num_M = 2           # outer lay_number loop
    args.cross_MLP_layers_M = 2     # stacked cross layers per invocation
    args.dropout_M = 0.0            # inference: dropout is identity

    N = 256                         # tn = 128 -> 2 N-tiles: exercises the online-softmax grid
    key = jax.random.PRNGKey(0)
    k_data, k_params = jax.random.split(key)
    data = jax.random.normal(k_data, (N, args.hidden_dim_GRU), jnp.float32)
    params = init_params(k_params, args)

    # --- one-shot correctness check of the fused kernel vs a pure-JAX f32 reference ---
    sim0 = _cosine_max_sim_ref(data, params["memory"])
    pc = int(N * args.percent_selected_M)
    _, top0 = jax.lax.top_k(sim0, pc)
    mask0 = jnp.zeros((N, 1), jnp.float32).at[top0].set(1.0)

    m1_ref = _cross_layers_ref(params["memory"], data * mask0,
                               params["to_kv_w"], params["to_q_w"],
                               params["mutl_w"], params["mutl_b"],
                               args.heads_M, args.inner_dim_M)
    sim1_ref = _cosine_max_sim_ref(data, m1_ref)
    emb1_ref, rl1_ref, zl1_ref = _emb_standin_ref(data, m1_ref)

    kw, vw, qw, ow, ob = _prepare_weights(params, args.heads_M, args.inner_dim_M)
    m1, sim1, emb1, rl1, zl1 = cross_layers_fused(
        params["memory"], mask0, data, kw, vw, qw, ow, ob,
        num_layers=args.cross_MLP_layers_M, heads=args.heads_M,
        dim_heads=args.inner_dim_M, tn=_choose_tile(N))
    jax.block_until_ready((m1, sim1, emb1, rl1, zl1))

    np.testing.assert_allclose(np.asarray(m1), np.asarray(m1_ref), atol=1e-1, rtol=1e-1)
    np.testing.assert_allclose(np.asarray(sim1), np.asarray(sim1_ref), atol=1e-1, rtol=1e-1)
    np.testing.assert_allclose(np.asarray(emb1), np.asarray(emb1_ref), atol=1e-1, rtol=1e-1)
    np.testing.assert_allclose(float(rl1), float(rl1_ref), rtol=1e-1)
    np.testing.assert_allclose(float(zl1), float(zl1_ref), rtol=1e-1)

    # --- full forward (istest=False), jitted so top-k / mask glue fuses between launches ---
    fwd = jax.jit(lambda p, d: landmark_mark_match_forward(p, d, istest=False, args=args))
    sim_m, out_ebs, result_loss, zloss = fwd(params, data)
    jax.block_until_ready((sim_m, out_ebs, result_loss, zloss))

    assert sim_m.shape == (N,)
    assert out_ebs.shape == (N, args.M_dim_M)
    assert bool(jnp.all(jnp.isfinite(sim_m)))
    assert bool(jnp.all(jnp.isfinite(out_ebs)))
    assert bool(jnp.isfinite(result_loss)) and bool(jnp.isfinite(zloss))
    print("KERNEL_OK")
</pallas_src>

<mosaic_0001>
module attributes {stable_mosaic.version = 11 : i64} {
  func.func @_landmark_fused_kernel(%arg0: i32, %arg1: i32, %arg2: memref<8x32xf32, #tpu.memory_space<vmem>>, %arg3: memref<128x1xf32, #tpu.memory_space<vmem>>, %arg4: memref<128x32xf32, #tpu.memory_space<vmem>>, %arg5: memref<2x32x16xbf16, #tpu.memory_space<vmem>>, %arg6: memref<2x32x16xbf16, #tpu.memory_space<vmem>>, %arg7: memref<1x2x32x16xbf16, #tpu.memory_space<vmem>>, %arg8: memref<1x2x16x32xbf16, #tpu.memory_space<vmem>>, %arg9: memref<1x1x32xf32, #tpu.memory_space<vmem>>, %arg10: memref<8x32xf32, #tpu.memory_space<vmem>>, %arg11: memref<1x128xf32, #tpu.memory_space<vmem>>, %arg12: memref<128x32xf32, #tpu.memory_space<vmem>>, %arg13: memref<1x1xf32, #tpu.memory_space<vmem>>, %arg14: memref<1x1xf32, #tpu.memory_space<vmem>>, %arg15: memref<8x32xf32, #tpu.memory_space<vmem>>, %arg16: memref<2x8x16xbf16, #tpu.memory_space<vmem>>, %arg17: memref<2x8x1xf32, #tpu.memory_space<vmem>>, %arg18: memref<2x8x1xf32, #tpu.memory_space<vmem>>, %arg19: memref<2x8x16xf32, #tpu.memory_space<vmem>>, %arg20: memref<1x1xf32, #tpu.memory_space<vmem>>, %arg21: memref<1x1xf32, #tpu.memory_space<vmem>>) attributes {dimension_semantics = [#tpu.dimension_semantics<arbitrary>, #tpu.dimension_semantics<arbitrary>], iteration_bounds = array<i64: 3, 2>, scalar_prefetch = 0 : i64, scratch_operands = 7 : i64, tpu.core_type = #tpu.core_type<tc>, window_params = [{pipeline_mode = #tpu.pipeline_mode<synchronous>, transform_indices = @transform_0, window_bounds = array<i64: 8, 32>}, {transform_indices = @transform_1, window_bounds = array<i64: 128, 1>}, {transform_indices = @transform_2, window_bounds = array<i64: 128, 32>}, {pipeline_mode = #tpu.pipeline_mode<synchronous>, transform_indices = @transform_3, window_bounds = array<i64: 2, 32, 16>}, {pipeline_mode = #tpu.pipeline_mode<synchronous>, transform_indices = @transform_4, window_bounds = array<i64: 2, 32, 16>}, {transform_indices = @transform_5, window_bounds = array<i64: 1, 2, 32, 16>}, {transform_indices = @transform_6, window_bounds = array<i64: 1, 2, 16, 32>}, {transform_indices = @transform_7, window_bounds = array<i64: 1, 1, 32>}, {pipeline_mode = #tpu.pipeline_mode<synchronous>, transform_indices = @transform_8, window_bounds = array<i64: 8, 32>}, {transform_indices = @transform_9, window_bounds = array<i64: 1, 128>}, {transform_indices = @transform_10, window_bounds = array<i64: 128, 32>}, {pipeline_mode = #tpu.pipeline_mode<synchronous>, transform_indices = @transform_11, window_bounds = array<i64: 1, 1>}, {pipeline_mode = #tpu.pipeline_mode<synchronous>, transform_indices = @transform_12, window_bounds = array<i64: 1, 1>}]} {
    %c0_i32 = arith.constant 0 : i32
    %0 = arith.cmpi eq, %arg0, %c0_i32 : i32
    %c0_i32_0 = arith.constant 0 : i32
    %1 = arith.cmpi eq, %arg1, %c0_i32_0 : i32
    %2 = arith.andi %0, %1 : i1
    %3 = arith.extui %2 : i1 to i32
    %c0_i32_1 = arith.constant 0 : i32
    %4 = arith.cmpi ne, %3, %c0_i32_1 : i32
    scf.if %4 {
      %c0 = arith.constant 0 : index
      %c0_5 = arith.constant 0 : index
      %11 = vector.load %arg2[%c0, %c0_5] : memref<8x32xf32, #tpu.memory_space<vmem>>, vector<8x32xf32>
      %c0_6 = arith.constant 0 : index
      %c0_7 = arith.constant 0 : index
      %12 = vector.load %arg15[%c0_6, %c0_7] : memref<8x32xf32, #tpu.memory_space<vmem>>, vector<8x32xf32>
      tpu.vector_store %arg15[%c0_6, %c0_7], %11 {strides = array<i32>} : memref<8x32xf32, #tpu.memory_space<vmem>>, vector<8x32xf32>,
    } else {
    }
    %c2_i32 = arith.constant 2 : i32
    %5 = arith.cmpi slt, %arg0, %c2_i32 : i32
    %6 = arith.extui %5 : i1 to i32
    %c0_i32_2 = arith.constant 0 : i32
    %7 = arith.cmpi ne, %6, %c0_i32_2 : i32
    scf.if %7 {
      %c0_i32_5 = arith.constant 0 : i32
      %11 = arith.cmpi eq, %arg1, %c0_i32_5 : i32
      %12 = arith.extui %11 : i1 to i32
      %c0_i32_6 = arith.constant 0 : i32
      %13 = arith.cmpi ne, %12, %c0_i32_6 : i32
      scf.if %13 {
        %c0_44 = arith.constant 0 : index
        %c0_45 = arith.constant 0 : index
        %58 = vector.load %arg15[%c0_44, %c0_45] : memref<8x32xf32, #tpu.memory_space<vmem>>, vector<8x32xf32>
        %59 = arith.truncf %58 : vector<8x32xf32> to vector<8x32xbf16>
        %60 = vector.shape_cast %59 : vector<8x32xbf16> to vector<1x8x32xbf16>
        %61 = vector.shape_cast %60 : vector<1x8x32xbf16> to vector<1x8x32xbf16>
        %62 = vector.broadcast %61 : vector<1x8x32xbf16> to vector<2x8x32xbf16>
        %c0_46 = arith.constant 0 : index
        %c0_47 = arith.constant 0 : index
        %c0_48 = arith.constant 0 : index
        %c0_49 = arith.constant 0 : index
        %63 = vector.load %arg7[%c0_46, %c0_47, %c0_48, %c0_49] : memref<1x2x32x16xbf16, #tpu.memory_space<vmem>>, vector<1x2x32x16xbf16>
        %64 = vector.shape_cast %63 : vector<1x2x32x16xbf16> to vector<2x32x16xbf16>
        "tpu.trace_start"() <{level = 10 : i32, message = "hmk,hkd->hmd"}> : () -> ()
        %cst_50 = arith.constant dense<0.000000e+00> : vector<2x8x16xf32>
        %65 = tpu.matmul %62, %64, %cst_50 {dimension_numbers = #tpu.dot_dimension_numbers<[2], [1], [1], [2], [0, 0, 0, 1, 1, 2], [0], [0]>} : vector<2x8x32xbf16>, vector<2x32x16xbf16>, vector<2x8x16xf32> -> vector<2x8x16xf32>
        "tpu.trace_stop"() : () -> ()
        %66 = arith.truncf %65 : vector<2x8x16xf32> to vector<2x8x16xbf16>
        %c0_51 = arith.constant 0 : index
        %c0_52 = arith.constant 0 : index
        %c0_53 = arith.constant 0 : index
        %67 = vector.load %arg16[%c0_51, %c0_52, %c0_53] : memref<2x8x16xbf16, #tpu.memory_space<vmem>>, vector<2x8x16xbf16>
        tpu.vector_store %arg16[%c0_51, %c0_52, %c0_53], %66 {strides = array<i32>} : memref<2x8x16xbf16, #tpu.memory_space<vmem>>, vector<2x8x16xbf16>,
        %cst_54 = arith.constant 0xFF800000 : f32
        %68 = vector.broadcast %cst_54 : f32 to vector<2x8x1xf32>
        %c0_55 = arith.constant 0 : index
        %c0_56 = arith.constant 0 : index
        %c0_57 = arith.constant 0 : index
        %69 = vector.load %arg17[%c0_55, %c0_56, %c0_57] : memref<2x8x1xf32, #tpu.memory_space<vmem>>, vector<2x8x1xf32>
        tpu.vector_store %arg17[%c0_55, %c0_56, %c0_57], %68 {strides = array<i32>} : memref<2x8x1xf32, #tpu.memory_space<vmem>>, vector<2x8x1xf32>,
        %cst_58 = arith.constant 0.000000e+00 : f32
        %70 = vector.broadcast %cst_58 : f32 to vector<2x8x1xf32>
        %c0_59 = arith.constant 0 : index
        %c0_60 = arith.constant 0 : index
        %c0_61 = arith.constant 0 : index
        %71 = vector.load %arg18[%c0_59, %c0_60, %c0_61] : memref<2x8x1xf32, #tpu.memory_space<vmem>>, vector<2x8x1xf32>
        tpu.vector_store %arg18[%c0_59, %c0_60, %c0_61], %70 {strides = array<i32>} : memref<2x8x1xf32, #tpu.memory_space<vmem>>, vector<2x8x1xf32>,
        %cst_62 = arith.constant 0.000000e+00 : f32
        %72 = vector.broadcast %cst_62 : f32 to vector<2x8x16xf32>
        %c0_63 = arith.constant 0 : index
        %c0_64 = arith.constant 0 : index
        %c0_65 = arith.constant 0 : index
        %73 = vector.load %arg19[%c0_63, %c0_64, %c0_65] : memref<2x8x16xf32, #tpu.memory_space<vmem>>, vector<2x8x16xf32>
        tpu.vector_store %arg19[%c0_63, %c0_64, %c0_65], %72 {strides = array<i32>} : memref<2x8x16xf32, #tpu.memory_space<vmem>>, vector<2x8x16xf32>,
      } else {
      }
      %c0 = arith.constant 0 : index
      %c0_7 = arith.constant 0 : index
      %14 = vector.load %arg4[%c0, %c0_7] : memref<128x32xf32, #tpu.memory_space<vmem>>, vector<128x32xf32>
      %c0_8 = arith.constant 0 : index
      %c0_9 = arith.constant 0 : index
      %15 = vector.load %arg3[%c0_8, %c0_9] : memref<128x1xf32, #tpu.memory_space<vmem>>, vector<128x1xf32>
      %16 = vector.broadcast %15 : vector<128x1xf32> to vector<128x32xf32>
      %17 = arith.mulf %14, %16 : vector<128x32xf32>
      %18 = arith.truncf %17 : vector<128x32xf32> to vector<128x32xbf16>
      %19 = vector.shape_cast %18 : vector<128x32xbf16> to vector<1x128x32xbf16>
      %20 = vector.shape_cast %19 : vector<1x128x32xbf16> to vector<1x128x32xbf16>
      %21 = vector.broadcast %20 : vector<1x128x32xbf16> to vector<2x128x32xbf16>
      %c0_10 = arith.constant 0 : index
      %c0_11 = arith.constant 0 : index
      %c0_12 = arith.constant 0 : index
      %22 = vector.load %arg5[%c0_10, %c0_11, %c0_12] : memref<2x32x16xbf16, #tpu.memory_space<vmem>>, vector<2x32x16xbf16>
      "tpu.trace_start"() <{level = 10 : i32, message = "hnk,hkd->hnd"}> : () -> ()
      %cst = arith.constant dense<0.000000e+00> : vector<2x128x16xf32>
      %23 = tpu.matmul %21, %22, %cst {dimension_numbers = #tpu.dot_dimension_numbers<[2], [1], [1], [2], [0, 0, 0, 1, 1, 2], [0], [0]>} : vector<2x128x32xbf16>, vector<2x32x16xbf16>, vector<2x128x16xf32> -> vector<2x128x16xf32>
      "tpu.trace_stop"() : () -> ()
      %24 = arith.truncf %23 : vector<2x128x16xf32> to vector<2x128x16xbf16>
      %c0_13 = arith.constant 0 : index
      %c0_14 = arith.constant 0 : index
      %c0_15 = arith.constant 0 : index
      %25 = vector.load %arg6[%c0_13, %c0_14, %c0_15] : memref<2x32x16xbf16, #tpu.memory_space<vmem>>, vector<2x32x16xbf16>
      "tpu.trace_start"() <{level = 10 : i32, message = "hnk,hkd->hnd"}> : () -> ()
      %cst_16 = arith.constant dense<0.000000e+00> : vector<2x128x16xf32>
      %26 = tpu.matmul %21, %25, %cst_16 {dimension_numbers = #tpu.dot_dimension_numbers<[2], [1], [1], [2], [0, 0, 0, 1, 1, 2], [0], [0]>} : vector<2x128x32xbf16>, vector<2x32x16xbf16>, vector<2x128x16xf32> -> vector<2x128x16xf32>
      "tpu.trace_stop"() : () -> ()
      %27 = arith.truncf %26 : vector<2x128x16xf32> to vector<2x128x16xbf16>
      %c0_17 = arith.constant 0 : index
      %c0_18 = arith.constant 0 : index
      %c0_19 = arith.constant 0 : index
      %28 = vector.load %arg16[%c0_17, %c0_18, %c0_19] : memref<2x8x16xbf16, #tpu.memory_space<vmem>>, vector<2x8x16xbf16>
      "tpu.trace_start"() <{level = 10 : i32, message = "hmd,hnd->hmn"}> : () -> ()
      %cst_20 = arith.constant dense<0.000000e+00> : vector<2x8x128xf32>
      %29 = tpu.matmul %28, %24, %cst_20 {dimension_numbers = #tpu.dot_dimension_numbers<[2], [2], [1], [1], [0, 0, 0, 1, 1, 1], [0], [0]>} : vector<2x8x16xbf16>, vector<2x128x16xbf16>, vector<2x8x128xf32> -> vector<2x8x128xf32>
      "tpu.trace_stop"() : () -> ()
      %cst_21 = arith.constant 2.500000e-01 : f32
      %30 = vector.broadcast %cst_21 : f32 to vector<2x8x128xf32>
      %31 = arith.mulf %29, %30 : vector<2x8x128xf32>
      %c0_22 = arith.constant 0 : index
      %c0_23 = arith.constant 0 : index
      %c0_24 = arith.constant 0 : index
      %32 = vector.load %arg17[%c0_22, %c0_23, %c0_24] : memref<2x8x1xf32, #tpu.memory_space<vmem>>, vector<2x8x1xf32>
      %cst_25 = arith.constant dense<0xFF800000> : vector<2x8xf32>
      %33 = vector.multi_reduction <maximumf>, %31, %cst_25 [2] : vector<2x8x128xf32> to vector<2x8xf32>
      %34 = vector.shape_cast %33 : vector<2x8xf32> to vector<2x8x1xf32>
      %35 = arith.maximumf %32, %34 : vector<2x8x1xf32>
      %36 = arith.subf %32, %35 : vector<2x8x1xf32>
      %37 = math.exp %36 : vector<2x8x1xf32>
      %38 = vector.broadcast %35 : vector<2x8x1xf32> to vector<2x8x128xf32>
      %39 = arith.subf %31, %38 : vector<2x8x128xf32>
      %40 = math.exp %39 : vector<2x8x128xf32>
      %c0_26 = arith.constant 0 : index
      %c0_27 = arith.constant 0 : index
      %c0_28 = arith.constant 0 : index
      %41 = vector.load %arg18[%c0_26, %c0_27, %c0_28] : memref<2x8x1xf32, #tpu.memory_space<vmem>>, vector<2x8x1xf32>
      %42 = arith.mulf %37, %41 : vector<2x8x1xf32>
      %cst_29 = arith.constant dense<0.000000e+00> : vector<2x8xf32>
      %43 = vector.multi_reduction <add>, %40, %cst_29 [2] : vector<2x8x128xf32> to vector<2x8xf32>
      %44 = vector.shape_cast %43 : vector<2x8xf32> to vector<2x8x1xf32>
      %45 = arith.addf %42, %44 : vector<2x8x1xf32>
      %c0_30 = arith.constant 0 : index
      %c0_31 = arith.constant 0 : index
      %c0_32 = arith.constant 0 : index
      %46 = vector.load %arg18[%c0_30, %c0_31, %c0_32] : memref<2x8x1xf32, #tpu.memory_space<vmem>>, vector<2x8x1xf32>
      tpu.vector_store %arg18[%c0_30, %c0_31, %c0_32], %45 {strides = array<i32>} : memref<2x8x1xf32, #tpu.memory_space<vmem>>, vector<2x8x1xf32>,
      %c0_33 = arith.constant 0 : index
      %c0_34 = arith.constant 0 : index
      %c0_35 = arith.constant 0 : index
      %47 = vector.load %arg19[%c0_33, %c0_34, %c0_35] : memref<2x8x16xf32, #tpu.memory_space<vmem>>, vector<2x8x16xf32>
      %48 = vector.broadcast %37 : vector<2x8x1xf32> to vector<2x8x16xf32>
      %49 = arith.mulf %48, %47 : vector<2x8x16xf32>
      %50 = arith.truncf %40 : vector<2x8x128xf32> to vector<2x8x128xbf16>
      "tpu.trace_start"() <{level = 10 : i32, message = "hmn,hnd->hmd"}> : () -> ()
      %cst_36 = arith.constant dense<0.000000e+00> : vector<2x8x16xf32>
      %51 = tpu.matmul %50, %27, %cst_36 {dimension_numbers = #tpu.dot_dimension_numbers<[2], [1], [1], [2], [0, 0, 0, 1, 1, 2], [0], [0]>} : vector<2x8x128xbf16>, vector<2x128x16xbf16>, vector<2x8x16xf32> -> vector<2x8x16xf32>
      "tpu.trace_stop"() : () -> ()
      %52 = arith.addf %49, %51 : vector<2x8x16xf32>
      %c0_37 = arith.constant 0 : index
      %c0_38 = arith.constant 0 : index
      %c0_39 = arith.constant 0 : index
      %53 = vector.load %arg19[%c0_37, %c0_38, %c0_39] : memref<2x8x16xf32, #tpu.memory_space<vmem>>, vector<2x8x16xf32>
      tpu.vector_store %arg19[%c0_37, %c0_38, %c0_39], %52 {strides = array<i32>} : memref<2x8x16xf32, #tpu.memory_space<vmem>>, vector<2x8x16xf32>,
      %c0_40 = arith.constant 0 : index
      %c0_41 = arith.constant 0 : index
      %c0_42 = arith.constant 0 : index
      %54 = vector.load %arg17[%c0_40, %c0_41, %c0_42] : memref<2x8x1xf32, #tpu.memory_space<vmem>>, vector<2x8x1xf32>
      tpu.vector_store %arg17[%c0_40, %c0_41, %c0_42], %35 {strides = array<i32>} : memref<2x8x1xf32, #tpu.memory_space<vmem>>, vector<2x8x1xf32>,
      %c1_i32 = arith.constant 1 : i32
      %55 = arith.cmpi eq, %arg1, %c1_i32 : i32
      %56 = arith.extui %55 : i1 to i32
      %c0_i32_43 = arith.constant 0 : i32
      %57 = arith.cmpi ne, %56, %c0_i32_43 : i32
      scf.if %57 {
        %c0_44 = arith.constant 0 : index
        %c0_45 = arith.constant 0 : index
        %c0_46 = arith.constant 0 : index
        %58 = vector.load %arg19[%c0_44, %c0_45, %c0_46] : memref<2x8x16xf32, #tpu.memory_space<vmem>>, vector<2x8x16xf32>
        %c0_47 = arith.constant 0 : index
        %c0_48 = arith.constant 0 : index
        %c0_49 = arith.constant 0 : index
        %59 = vector.load %arg18[%c0_47, %c0_48, %c0_49] : memref<2x8x1xf32, #tpu.memory_space<vmem>>, vector<2x8x1xf32>
        %60 = tpu.reciprocal %59 {approx = true} : vector<2x8x1xf32> -> vector<2x8x1xf32>
        %61 = vector.broadcast %60 : vector<2x8x1xf32> to vector<2x8x16xf32>
        %62 = arith.mulf %58, %61 : vector<2x8x16xf32>
        %63 = arith.truncf %62 : vector<2x8x16xf32> to vector<2x8x16xbf16>
        %c0_50 = arith.constant 0 : index
        %c0_51 = arith.constant 0 : index
        %c0_52 = arith.constant 0 : index
        %c0_53 = arith.constant 0 : index
        %64 = vector.load %arg8[%c0_50, %c0_51, %c0_52, %c0_53] : memref<1x2x16x32xbf16, #tpu.memory_space<vmem>>, vector<1x2x16x32xbf16>
        %65 = vector.shape_cast %64 : vector<1x2x16x32xbf16> to vector<2x16x32xbf16>
        "tpu.trace_start"() <{level = 10 : i32, message = "hmd,hdo->hmo"}> : () -> ()
        %cst_54 = arith.constant dense<0.000000e+00> : vector<2x8x32xf32>
        %66 = tpu.matmul %63, %65, %cst_54 {dimension_numbers = #tpu.dot_dimension_numbers<[2], [1], [1], [2], [0, 0, 0, 1, 1, 2], [0], [0]>} : vector<2x8x16xbf16>, vector<2x16x32xbf16>, vector<2x8x32xf32> -> vector<2x8x32xf32>
        "tpu.trace_stop"() : () -> ()
        %cst_55 = arith.constant dense<0.000000e+00> : vector<8x32xf32>
        %67 = vector.multi_reduction <add>, %66, %cst_55 [0] : vector<2x8x32xf32> to vector<8x32xf32>
        %c0_56 = arith.constant 0 : index
        %c0_57 = arith.constant 0 : index
        %c0_58 = arith.constant 0 : index
        %68 = vector.load %arg9[%c0_56, %c0_57, %c0_58] : memref<1x1x32xf32, #tpu.memory_space<vmem>>, vector<1x1x32xf32>
        %69 = vector.shape_cast %68 : vector<1x1x32xf32> to vector<1x32xf32>
        %70 = vector.broadcast %69 : vector<1x32xf32> to vector<8x32xf32>
        %71 = arith.addf %67, %70 : vector<8x32xf32>
        %c0_59 = arith.constant 0 : index
        %c0_60 = arith.constant 0 : index
        %72 = vector.load %arg15[%c0_59, %c0_60] : memref<8x32xf32, #tpu.memory_space<vmem>>, vector<8x32xf32>
        %73 = arith.addf %71, %72 : vector<8x32xf32>
        %cst_61 = arith.constant dense<0.000000e+00> : vector<8xf32>
        %74 = vector.multi_reduction <add>, %73, %cst_61 [1] : vector<8x32xf32> to vector<8xf32>
        %75 = vector.shape_cast %74 : vector<8xf32> to vector<8x1xf32>
        %cst_62 = arith.constant 3.200000e+01 : f32
        %76 = vector.broadcast %cst_62 : f32 to vector<8x1xf32>
        %77 = arith.divf %75, %76 : vector<8x1xf32>
        %78 = vector.broadcast %77 : vector<8x1xf32> to vector<8x32xf32>
        %79 = arith.subf %73, %78 : vector<8x32xf32>
        %80 = vector.broadcast %77 : vector<8x1xf32> to vector<8x32xf32>
        %81 = arith.subf %73, %80 : vector<8x32xf32>
        %82 = arith.mulf %79, %81 : vector<8x32xf32>
        %cst_63 = arith.constant dense<0.000000e+00> : vector<8xf32>
        %83 = vector.multi_reduction <add>, %82, %cst_63 [1] : vector<8x32xf32> to vector<8xf32>
        %84 = vector.shape_cast %83 : vector<8xf32> to vector<8x1xf32>
        %cst_64 = arith.constant 3.200000e+01 : f32
        %85 = vector.broadcast %cst_64 : f32 to vector<8x1xf32>
        %86 = arith.divf %84, %85 : vector<8x1xf32>
        %87 = vector.broadcast %77 : vector<8x1xf32> to vector<8x32xf32>
        %88 = arith.subf %73, %87 : vector<8x32xf32>
        %cst_65 = arith.constant 9.99999974E-6 : f32
        %89 = vector.broadcast %cst_65 : f32 to vector<8x1xf32>
        %90 = arith.addf %86, %89 : vector<8x1xf32>
        %91 = math.rsqrt %90 : vector<8x1xf32>
        %92 = vector.broadcast %91 : vector<8x1xf32> to vector<8x32xf32>
        %93 = arith.mulf %88, %92 : vector<8x32xf32>
        %c0_66 = arith.constant 0 : index
        %c0_67 = arith.constant 0 : index
        %94 = vector.load %arg15[%c0_66, %c0_67] : memref<8x32xf32, #tpu.memory_space<vmem>>, vector<8x32xf32>
        tpu.vector_store %arg15[%c0_66, %c0_67], %93 {strides = array<i32>} : memref<8x32xf32, #tpu.memory_space<vmem>>, vector<8x32xf32>,
      } else {
      }
    } else {
    }
    %c2_i32_3 = arith.constant 2 : i32
    %8 = arith.cmpi eq, %arg0, %c2_i32_3 : i32
    %9 = arith.extui %8 : i1 to i32
    %c0_i32_4 = arith.constant 0 : i32
    %10 = arith.cmpi ne, %9, %c0_i32_4 : i32
    scf.if %10 {
      %c0 = arith.constant 0 : index
      %c0_5 = arith.constant 0 : index
      %11 = vector.load %arg4[%c0, %c0_5] : memref<128x32xf32, #tpu.memory_space<vmem>>, vector<128x32xf32>
      %c0_6 = arith.constant 0 : index
      %c0_7 = arith.constant 0 : index
      %12 = vector.load %arg15[%c0_6, %c0_7] : memref<8x32xf32, #tpu.memory_space<vmem>>, vector<8x32xf32>
      %13 = arith.mulf %11, %11 : vector<128x32xf32>
      %cst = arith.constant dense<0.000000e+00> : vector<128xf32>
      %14 = vector.multi_reduction <add>, %13, %cst [1] : vector<128x32xf32> to vector<128xf32>
      %15 = vector.shape_cast %14 : vector<128xf32> to vector<128x1xf32>
      %cst_8 = arith.constant 9.99999996E-13 : f32
      %16 = vector.broadcast %cst_8 : f32 to vector<128x1xf32>
      %17 = arith.addf %15, %16 : vector<128x1xf32>
      %18 = math.rsqrt %17 : vector<128x1xf32>
      %19 = vector.broadcast %18 : vector<128x1xf32> to vector<128x32xf32>
      %20 = arith.mulf %11, %19 : vector<128x32xf32>
      %21 = arith.truncf %20 : vector<128x32xf32> to vector<128x32xbf16>
      %22 = arith.mulf %12, %12 : vector<8x32xf32>
      %cst_9 = arith.constant dense<0.000000e+00> : vector<8xf32>
      %23 = vector.multi_reduction <add>, %22, %cst_9 [1] : vector<8x32xf32> to vector<8xf32>
      %24 = vector.shape_cast %23 : vector<8xf32> to vector<8x1xf32>
      %cst_10 = arith.constant 9.99999996E-13 : f32
      %25 = vector.broadcast %cst_10 : f32 to vector<8x1xf32>
      %26 = arith.addf %24, %25 : vector<8x1xf32>
      %27 = math.rsqrt %26 : vector<8x1xf32>
      %28 = vector.broadcast %27 : vector<8x1xf32> to vector<8x32xf32>
      %29 = arith.mulf %12, %28 : vector<8x32xf32>
      %30 = arith.truncf %29 : vector<8x32xf32> to vector<8x32xbf16>
      %cst_11 = arith.constant dense<0.000000e+00> : vector<8x128xf32>
      %31 = tpu.matmul %30, %21, %cst_11 {dimension_numbers = #tpu.dot_dimension_numbers<[1], [1], [0], [0], [0, 0, 1, 0], [], []>} : vector<8x32xbf16>, vector<128x32xbf16>, vector<8x128xf32> -> vector<8x128xf32>
      %cst_12 = arith.constant dense<0xFF800000> : vector<128xf32>
      %32 = vector.multi_reduction <maximumf>, %31, %cst_12 [0] : vector<8x128xf32> to vector<128xf32>
      %33 = vector.shape_cast %32 : vector<128xf32> to vector<1x128xf32>
      %c0_13 = arith.constant 0 : index
      %c0_14 = arith.constant 0 : index
      %34 = vector.load %arg11[%c0_13, %c0_14] : memref<1x128xf32, #tpu.memory_space<vmem>>, vector<1x128xf32>
      tpu.vector_store %arg11[%c0_13, %c0_14], %33 {strides = array<i32>} : memref<1x128xf32, #tpu.memory_space<vmem>>, vector<1x128xf32>,
      %35 = arith.truncf %11 : vector<128x32xf32> to vector<128x32xbf16>
      %36 = arith.truncf %12 : vector<8x32xf32> to vector<8x32xbf16>
      %cst_15 = arith.constant dense<0.000000e+00> : vector<128x8xf32>
      %37 = tpu.matmul %35, %36, %cst_15 {dimension_numbers = #tpu.dot_dimension_numbers<[1], [1], [0], [0], [0, 0, 1, 0], [], []>} : vector<128x32xbf16>, vector<8x32xbf16>, vector<128x8xf32> -> vector<128x8xf32>
      %cst_16 = arith.constant 0.176776692 : f32
      %38 = vector.broadcast %cst_16 : f32 to vector<128x8xf32>
      %39 = arith.mulf %37, %38 : vector<128x8xf32>
      %cst_17 = arith.constant dense<0xFF800000> : vector<128xf32>
      %40 = vector.multi_reduction <maximumf>, %39, %cst_17 [1] : vector<128x8xf32> to vector<128xf32>
      %41 = vector.shape_cast %40 : vector<128xf32> to vector<128x1xf32>
      %42 = vector.broadcast %41 : vector<128x1xf32> to vector<128x8xf32>
      %43 = arith.subf %39, %42 : vector<128x8xf32>
      %44 = math.exp %43 : vector<128x8xf32>
      %cst_18 = arith.constant dense<0.000000e+00> : vector<128xf32>
      %45 = vector.multi_reduction <add>, %44, %cst_18 [1] : vector<128x8xf32> to vector<128xf32>
      %46 = vector.shape_cast %45 : vector<128xf32> to vector<128x1xf32>
      %47 = tpu.reciprocal %46 {approx = true} : vector<128x1xf32> -> vector<128x1xf32>
      %48 = vector.broadcast %47 : vector<128x1xf32> to vector<128x8xf32>
      %49 = arith.mulf %44, %48 : vector<128x8xf32>
      %50 = arith.truncf %49 : vector<128x8xf32> to vector<128x8xbf16>
      %51 = arith.truncf %12 : vector<8x32xf32> to vector<8x32xbf16>
      %cst_19 = arith.constant dense<0.000000e+00> : vector<128x32xf32>
      %52 = tpu.matmul %50, %51, %cst_19 {dimension_numbers = #tpu.dot_dimension_numbers<[1], [0], [0], [1], [0, 0, 1, 1], [], []>} : vector<128x8xbf16>, vector<8x32xbf16>, vector<128x32xf32> -> vector<128x32xf32>
      %c0_20 = arith.constant 0 : index
      %c0_21 = arith.constant 0 : index
      %53 = vector.load %arg12[%c0_20, %c0_21] : memref<128x32xf32, #tpu.memory_space<vmem>>, vector<128x32xf32>
      tpu.vector_store %arg12[%c0_20, %c0_21], %52 {strides = array<i32>} : memref<128x32xf32, #tpu.memory_space<vmem>>, vector<128x32xf32>,
      %54 = math.log %46 : vector<128x1xf32>
      %55 = arith.addf %41, %54 : vector<128x1xf32>
      %c0_i32_22 = arith.constant 0 : i32
      %56 = arith.cmpi eq, %arg1, %c0_i32_22 : i32
      %57 = arith.extui %56 : i1 to i32
      %c0_i32_23 = arith.constant 0 : i32
      %58 = arith.cmpi ne, %57, %c0_i32_23 : i32
      scf.if %58 {
        %cst_36 = arith.constant 0.000000e+00 : f32
        %77 = vector.broadcast %cst_36 : f32 to vector<1x1xf32>
        %c0_37 = arith.constant 0 : index
        %c0_38 = arith.constant 0 : index
        %78 = vector.load %arg20[%c0_37, %c0_38] : memref<1x1xf32, #tpu.memory_space<vmem>>, vector<1x1xf32>
        tpu.vector_store %arg20[%c0_37, %c0_38], %77 {strides = array<i32>} : memref<1x1xf32, #tpu.memory_space<vmem>>, vector<1x1xf32>,
        %cst_39 = arith.constant 0.000000e+00 : f32
        %79 = vector.broadcast %cst_39 : f32 to vector<1x1xf32>
        %c0_40 = arith.constant 0 : index
        %c0_41 = arith.constant 0 : index
        %80 = vector.load %arg21[%c0_40, %c0_41] : memref<1x1xf32, #tpu.memory_space<vmem>>, vector<1x1xf32>
        tpu.vector_store %arg21[%c0_40, %c0_41], %79 {strides = array<i32>} : memref<1x1xf32, #tpu.memory_space<vmem>>, vector<1x1xf32>,
      } else {
      }
      %59 = arith.subf %52, %11 : vector<128x32xf32>
      %c0_24 = arith.constant 0 : index
      %c0_25 = arith.constant 0 : index
      %60 = vector.load %arg20[%c0_24, %c0_25] : memref<1x1xf32, #tpu.memory_space<vmem>>, vector<1x1xf32>
      %61 = arith.mulf %59, %59 : vector<128x32xf32>
      %cst_26 = arith.constant dense<0.000000e+00> : vector<128xf32>
      %62 = vector.multi_reduction <add>, %61, %cst_26 [1] : vector<128x32xf32> to vector<128xf32>
      %63 = vector.shape_cast %62 : vector<128xf32> to vector<128x1xf32>
      %cst_27 = arith.constant dense<0.000000e+00> : vector<1xf32>
      %64 = vector.multi_reduction <add>, %63, %cst_27 [0] : vector<128x1xf32> to vector<1xf32>
      %65 = vector.shape_cast %64 : vector<1xf32> to vector<1x1xf32>
      %66 = arith.addf %60, %65 : vector<1x1xf32>
      %c0_28 = arith.constant 0 : index
      %c0_29 = arith.constant 0 : index
      %67 = vector.load %arg20[%c0_28, %c0_29] : memref<1x1xf32, #tpu.memory_space<vmem>>, vector<1x1xf32>
      tpu.vector_store %arg20[%c0_28, %c0_29], %66 {strides = array<i32>} : memref<1x1xf32, #tpu.memory_space<vmem>>, vector<1x1xf32>,
      %c0_30 = arith.constant 0 : index
      %c0_31 = arith.constant 0 : index
      %68 = vector.load %arg21[%c0_30, %c0_31] : memref<1x1xf32, #tpu.memory_space<vmem>>, vector<1x1xf32>
      %69 = arith.mulf %55, %55 : vector<128x1xf32>
      %cst_32 = arith.constant dense<0.000000e+00> : vector<1xf32>
      %70 = vector.multi_reduction <add>, %69, %cst_32 [0] : vector<128x1xf32> to vector<1xf32>
      %71 = vector.shape_cast %70 : vector<1xf32> to vector<1x1xf32>
      %72 = arith.addf %68, %71 : vector<1x1xf32>
      %c0_33 = arith.constant 0 : index
      %c0_34 = arith.constant 0 : index
      %73 = vector.load %arg21[%c0_33, %c0_34] : memref<1x1xf32, #tpu.memory_space<vmem>>, vector<1x1xf32>
      tpu.vector_store %arg21[%c0_33, %c0_34], %72 {strides = array<i32>} : memref<1x1xf32, #tpu.memory_space<vmem>>, vector<1x1xf32>,
      %c1_i32 = arith.constant 1 : i32
      %74 = arith.cmpi eq, %arg1, %c1_i32 : i32
      %75 = arith.extui %74 : i1 to i32
      %c0_i32_35 = arith.constant 0 : i32
      %76 = arith.cmpi ne, %75, %c0_i32_35 : i32
      scf.if %76 {
        %c0_36 = arith.constant 0 : index
        %c0_37 = arith.constant 0 : index
        %77 = vector.load %arg10[%c0_36, %c0_37] : memref<8x32xf32, #tpu.memory_space<vmem>>, vector<8x32xf32>
        tpu.vector_store %arg10[%c0_36, %c0_37], %12 {strides = array<i32>} : memref<8x32xf32, #tpu.memory_space<vmem>>, vector<8x32xf32>,
        %c0_38 = arith.constant 0 : index
        %c0_39 = arith.constant 0 : index
        %78 = vector.load %arg20[%c0_38, %c0_39] : memref<1x1xf32, #tpu.memory_space<vmem>>, vector<1x1xf32>
        %cst_40 = arith.constant 1.22070313E-4 : f32
        %79 = vector.broadcast %cst_40 : f32 to vector<1x1xf32>
        %80 = arith.mulf %78, %79 : vector<1x1xf32>
        %c0_41 = arith.constant 0 : index
        %c0_42 = arith.constant 0 : index
        %81 = vector.load %arg13[%c0_41, %c0_42] : memref<1x1xf32, #tpu.memory_space<vmem>>, vector<1x1xf32>
        tpu.vector_store %arg13[%c0_41, %c0_42], %80 {strides = array<i32>} : memref<1x1xf32, #tpu.memory_space<vmem>>, vector<1x1xf32>,
        %c0_43 = arith.constant 0 : index
        %c0_44 = arith.constant 0 : index
        %82 = vector.load %arg21[%c0_43, %c0_44] : memref<1x1xf32, #tpu.memory_space<vmem>>, vector<1x1xf32>
        %cst_45 = arith.constant 3.906250e-03 : f32
        %83 = vector.broadcast %cst_45 : f32 to vector<1x1xf32>
        %84 = arith.mulf %82, %83 : vector<1x1xf32>
        %c0_46 = arith.constant 0 : index
        %c0_47 = arith.constant 0 : index
        %85 = vector.load %arg14[%c0_46, %c0_47] : memref<1x1xf32, #tpu.memory_space<vmem>>, vector<1x1xf32>
        tpu.vector_store %arg14[%c0_46, %c0_47], %84 {strides = array<i32>} : memref<1x1xf32, #tpu.memory_space<vmem>>, vector<1x1xf32>,
      } else {
      }
    } else {
    }
    return
  }
  func.func @transform_0(%arg0: i32, %arg1: i32) -> (i32, i32) {
    %c0_i32 = arith.constant 0 : i32
    %c0_i32_0 = arith.constant 0 : i32
    %c0_i32_1 = arith.constant 0 : i32
    return %c0_i32, %c0_i32_0 : i32, i32
  }
  func.func @transform_1(%arg0: i32, %arg1: i32) -> (i32, i32) {
    %c0_i32 = arith.constant 0 : i32
    %c0_i32_0 = arith.constant 0 : i32
    return %arg1, %c0_i32 : i32, i32
  }
  func.func @transform_2(%arg0: i32, %arg1: i32) -> (i32, i32) {
    %c0_i32 = arith.constant 0 : i32
    %c0_i32_0 = arith.constant 0 : i32
    return %arg1, %c0_i32 : i32, i32
  }
  func.func @transform_3(%arg0: i32, %arg1: i32) -> (i32, i32, i32) {
    %c0_i32 = arith.constant 0 : i32
    %c0_i32_0 = arith.constant 0 : i32
    %c0_i32_1 = arith.constant 0 : i32
    %c0_i32_2 = arith.constant 0 : i32
    return %c0_i32, %c0_i32_0, %c0_i32_1 : i32, i32, i32
  }
  func.func @transform_4(%arg0: i32, %arg1: i32) -> (i32, i32, i32) {
    %c0_i32 = arith.constant 0 : i32
    %c0_i32_0 = arith.constant 0 : i32
    %c0_i32_1 = arith.constant 0 : i32
    %c0_i32_2 = arith.constant 0 : i32
    return %c0_i32, %c0_i32_0, %c0_i32_1 : i32, i32, i32
  }
  func.func @transform_5(%arg0: i32, %arg1: i32) -> (i32, i32, i32, i32) {
    %c0_i32 = arith.constant 0 : i32
    %c0_i32_0 = arith.constant 0 : i32
    %c0_i32_1 = arith.constant 0 : i32
    %c0_i32_2 = arith.constant 0 : i32
    return %arg0, %c0_i32, %c0_i32_0, %c0_i32_1 : i32, i32, i32, i32
  }
  func.func @transform_6(%arg0: i32, %arg1: i32) -> (i32, i32, i32, i32) {
    %c0_i32 = arith.constant 0 : i32
    %c0_i32_0 = arith.constant 0 : i32
    %c0_i32_1 = arith.constant 0 : i32
    %c0_i32_2 = arith.constant 0 : i32
    return %arg0, %c0_i32, %c0_i32_0, %c0_i32_1 : i32, i32, i32, i32
  }
  func.func @transform_7(%arg0: i32, %arg1: i32) -> (i32, i32, i32) {
    %c0_i32 = arith.constant 0 : i32
    %c0_i32_0 = arith.constant 0 : i32
    %c0_i32_1 = arith.constant 0 : i32
    return %arg0, %c0_i32, %c0_i32_0 : i32, i32, i32
  }
  func.func @transform_8(%arg0: i32, %arg1: i32) -> (i32, i32) {
    %c0_i32 = arith.constant 0 : i32
    %c0_i32_0 = arith.constant 0 : i32
    %c0_i32_1 = arith.constant 0 : i32
    return %c0_i32, %c0_i32_0 : i32, i32
  }
  func.func @transform_9(%arg0: i32, %arg1: i32) -> (i32, i32) {
    %c0_i32 = arith.constant 0 : i32
    %c0_i32_0 = arith.constant 0 : i32
    return %c0_i32, %arg1 : i32, i32
  }
  func.func @transform_10(%arg0: i32, %arg1: i32) -> (i32, i32) {
    %c0_i32 = arith.constant 0 : i32
    %c0_i32_0 = arith.constant 0 : i32
    return %arg1, %c0_i32 : i32, i32
  }
  func.func @transform_11(%arg0: i32, %arg1: i32) -> (i32, i32) {
    %c0_i32 = arith.constant 0 : i32
    %c0_i32_0 = arith.constant 0 : i32
    %c0_i32_1 = arith.constant 0 : i32
    return %c0_i32, %c0_i32_0 : i32, i32
  }
  func.func @transform_12(%arg0: i32, %arg1: i32) -> (i32, i32) {
    %c0_i32 = arith.constant 0 : i32
    %c0_i32_0 = arith.constant 0 : i32
    %c0_i32_1 = arith.constant 0 : i32
    return %c0_i32, %c0_i32_0 : i32, i32
  }
}

</mosaic_0001>

<bundles_post_ra>
// kernel: tpu_custom_call.1
= control target key start
LH: loop header
LB: loop body
LE: loop exit
PB: predicated region body
PF: predicated region fallthrough
CT: control target
= control target key end

     0   :  { %s4862_s0 = inlined_call_operand.vmem [shape: f32[8,32], index: 0, kind: input, shape index: {}, may-alias: {0,8}]   ;;  %s4863_s1 = inlined_call_operand.vmem [shape: f32[256,1], index: 1, kind: input, shape index: {}]   ;;  %s4864_s2 = inlined_call_operand.vmem [shape: f32[256,32], index: 2, kind: input, shape index: {}]   ;;  %s4865_s3 = inlined_call_operand.vmem [shape: bf16[2,32,16], index: 3, kind: input, shape index: {}]   ;;  %s4866_s4 = inlined_call_operand.vmem [shape: bf16[2,32,16], index: 4, kind: input, shape index: {}]   ;;  %s4867_s5 = inlined_call_operand.vmem [shape: bf16[3,2,32,16], index: 5, kind: input, shape index: {}]   ;;  %s4868_s6 = inlined_call_operand.vmem [shape: bf16[3,2,16,32], index: 6, kind: input, shape index: {}]   ;;  %s4869_s7 = inlined_call_operand.vmem [shape: f32[3,1,32], index: 7, kind: input, shape index: {}]   ;;  %s4870_s8 = inlined_call_operand.vmem [shape: f32[8,32], index: 8, kind: output, shape index: {0}, may-alias: {0,8}]   ;;  %s4871_s9 = inlined_call_operand.hbm [shape: f32[1,256], index: 9, kind: output, shape index: {1}]   ;;  %s4872_s10 = inlined_call_operand.vmem [shape: f32[256,32], index: 10, kind: output, shape index: {2}]   ;;  %s4873_s11 = inlined_call_operand.hbm [shape: f32[1,1], index: 11, kind: output, shape index: {3}]   ;;  %s4874_s12 = inlined_call_operand.hbm [shape: f32[1,1], index: 12, kind: output, shape index: {4}]  }
   0x1   :  { %4895 = sst [smem:[#allocation30_spill]] %s4863_s1 }
   0x2   :  { %4896 = sst [smem:[#allocation31_spill]] %s4864_s2 }
   0x3   :  { %4897 = sst [smem:[#allocation32_spill]] %s4871_s9 }
   0x4   :  { %4898 = sst [smem:[#allocation33_spill]] %s4873_s11 }
   0x5   :  { %4899 = sst [smem:[#allocation34_spill]] %s4874_s12 }
   0x6   :  { %18 = vsyncpa [#allocation10], 0 }
   0x7   :  { %20 = vsyncpa [#allocation10 + $0x1], 0 }
   0x8   :  { %21 = vsyncpa [#allocation12], 0  ;;  %s3802_s21 = smov 0   ;;  %s3804_s22 = smov 0  }
   0x9   :  { %s3806_s23 = smov 0   ;;  %s3808_s24 = smov 0  }
   0xa   :  { %s3810_s25 = smov 0   ;;  %s3812_s26 = smov 0  }
   0xb   :  { %s3814_s27 = smov 0   ;;  %s3816_s28 = smov 0  }
   0xc LB: > { %4900 = sst [smem:[#allocation16_spill]] %s3692_s21  ;;  %s2853_s29 = sadd.s32 4294967295, %s3720_s28   ;;  %s3720_s28 = sphi %s3816_s28, %s27_s28   ;;  %s3716_s27 = sphi %s3814_s27, %s4938_s27   ;;  %s3712_s26 = sphi %s3812_s26, %s4937_s26   ;;  %s3708_s25 = sphi %s3810_s25, %s4936_s25   ;;  %s3704_s24 = sphi %s3808_s24, %s4935_s24   ;;  %s3700_s23 = sphi %s3806_s23, %s4934_s23   ;;  %s3696_s22 = sphi %s3804_s22, %s4940_s22   ;;  %s3692_s21 = sphi %s3802_s21, %s4939_s21  }
   0xd   : > { %4901 = sst [smem:[#allocation17_spill]] %s3700_s23  ;;  %s2854_s30 = sadd.s32 4294967294, %s3720_s28  }
   0xe   : > { %4902 = sst [smem:[#allocation18_spill]] %s3712_s26  ;;  %s36_s13 = sadd.s32 1, %s3712_s26 }
   0xf   : > { %4903 = sst [smem:[#allocation19_spill]] %s3716_s27  ;;  %s39_s14 = sadd.s32 1, %s3716_s27 }
  0x10   : > { %4904 = sst [smem:[#allocation20_spill]] %s3720_s28  ;;  %p37_p0 = scmp.ge.s32.totalorder %s36_s13, 2 }
  0x11   : > { %s260_s15 = sadd.s32 1, %s3700_s23  ;;  %p270_p1 = scmp.ne.s32.totalorder %s3700_s23, %s3696_s22 }
  0x12   : > { %p3849_p2 = scmp.eq.s32.totalorder %s2853_s29, 5  ;;  %s4942_s13 = smov (%p37_p0, %s36_s13), 0 }
  0x13   : > { %4907 = sst [smem:[#allocation22_spill]] %s4942_s13  ;;  %s4944_s14 = smov (!%p37_p0, %s39_s14), %s3716_s27 }
  0x14   : > { %s4905_s16 = scalar_select %p3849_p2, 1, 0 }
  0x15   : > { %s257_s17 = ssub.s32 %s3712_s26, %s4942_s13  ;;  %p3860_p3 = por %p3849_p2, %p270_p1 }
  0x16   : > { %4906 = sst [smem:[#allocation21_spill]] %s4905_s16  ;;  %p41_p4 = scmp.ge.s32.totalorder %s4944_s14, 3 }
  0x17   : > { %s4908_s18 = scalar_select %p3860_p3, 1, 0 }
  0x18   : > { %p258_p5 = scmp.eq.s32.totalorder %s257_s17, 0  ;;  %p276_p6 = scmp.ne.s32.totalorder %s3696_s22, %s3692_s21 }
  0x19   : > { %4909 = sst [smem:[#allocation23_spill]] %s4908_s18  ;;  %p277_p7 = scmp.eq.s32.totalorder %s2854_s30, 5 }
  0x1a   : > { %s4946_s14 = smov (%p41_p4, %s4944_s14), 0  ;;  %p2857_p9 = scmp.ge.s32.totalorder %s3720_s28, 1 }
  0x1b   : > { %4910 = sst [smem:[#allocation24_spill]] %s4946_s14  ;;  %p3871_p8 = por %p277_p7, %p276_p6 }
  0x1c   : > { %s3869_s19 = scalar_select %p258_p5, %s3700_s23, %s260_s15  }
  0x1d   : > { %s4912_s20 = scalar_select %p3871_p8, 1, 0 }
  0x1e   : > { %4911 = sst [smem:[#allocation25_spill]] %s3869_s19  ;;  %p412_p10 = scmp.lt.s32.totalorder %s3720_s28, 7 }
  0x1f   : > { %4913 = sst [smem:[#allocation26_spill]] %s4912_s20 }
  0x20   : > { %p413_p11 = pnand %p2857_p9, %p412_p10 }
  0x21   : > { %s3879_s30 = sshll.u32 (!%p413_p11), %s3704_s24, 4  ;;  %p488_p13 = scmp.lt.s32.totalorder (!%p413_p11), %s3708_s25, 2 }
  0x22   : > { %416 = sbr.rel (%p413_p11) target bundleno = 3128 (0xc38), region = 52  ;;  %p477_p12 = scmp.lt.s32.totalorder (!%p413_p11), %s3879_s30, 31 }
  0x23   : > { %p508_p0 = scmp.eq.s32.totalorder (!%p413_p11), %s3708_s25, 0  ;;  %p509_p1 = scmp.eq.s32.totalorder (!%p413_p11), %s3704_s24, 0 }
  0x24   : > { %s4914_s1 = sld [smem:[#allocation30_spill]] (!%p413_p11)  ;;  %s4915_s2 = sld [smem:[#allocation31_spill]] (!%p413_p11) }
  0x25   : > { %p510_p4 = pnand (!%p413_p11), %p509_p1, %p508_p0 }
  0x29   : > { %s478_s15 = scalar_select %p477_p12, %s3879_s30, 31 }
  0x2a   : > { %s3886_s17 = scalar_select %p488_p13, %s3708_s25, 2 }
  0x2b   : > { %s2859_s14 = sshll.u32 %s478_s15, 3  ;;  %513 = sbr.rel (%p510_p4) target bundleno = 50 (0x32), region = 56  ;;  %v514_v0 = vld [vmem:[%s4862_s0] sm:$0xff] (!%p510_p4)  ;;  %vm515_vm0 = vcmask (!%p510_p4), 261120  }
  0x2c   : > { %s3892_s29 = scalar_lea.vmem %s4914_s1, %s2859_s14  ;;  %s3897_s23 = scalar_lea.vmem %s4915_s2, %s2859_s14  ;;  %516 = vst.msk [vmem:[#allocation2] sm:$0xff] (!%p510_p4), %vm515_vm0, %v514_v0 }
  0x2d   : > { %s2951_s20 = sshll.u32 %s3886_s17, 5  ;;  %s2952_s21 = sshll.u32 %s3886_s17, 4 }
  0x2e   : > { %s3904_s18 = scalar_lea.vmem %s4867_s5, %s2951_s20  ;;  %s3909_s9 = scalar_lea.vmem %s4868_s6, %s2952_s21 }
  0x2f   : > { %s500_s1 = scalar_lea.vmem %s4869_s7, %s3886_s17  ;;  %s3918_s19 = scalar_lea.vmem %s4872_s10, %s2859_s14 }
  0x30   : > { %s4916_s2 = sand.u32 1, %s3696_s22  }
  0x31   : > { %s3924_s12 = scalar_lea.vmem [#allocation9], %s4916_s2 }
  0x32 PF: > { %p2868_p5 = scmp.ge.s32.totalorder %s3708_s25, 2 }
  0x33   : > { %p2869_p6 = scmp.ne.s32.totalorder (!%p2868_p5), %s3704_s24, 0 }
  0x34   : > { %520 = sbr.rel (%p2868_p5) target bundleno = 2034 (0x7f2), region = 60 }
  0x3b   : > { %523 = sbr.rel (%p2869_p6) target bundleno = 284 (0x11c), region = 64  ;;  %vm647_vm1 = vcmask (!%p2869_p6), 7168   ;;  %vm652_vm2 = vcmask (!%p2869_p6), 130048   ;;  %v3722_v1 = vmov (!%p2869_p6), 0.0   ;;  %v3723_v2 = vmov (!%p2869_p6), -inf   ;;  %v3409_v3 = vld [vmem:[%s3904_s18] sm:$0xff] (!%p2869_p6)  }
  0x3c   : > { %3066 = vmatprep.subr.bf16.mxu0 (!%p2869_p6), %v3722_v1  ;;  %648 = vst.msk [vmem:[#allocation4] sm:$0xff] (!%p2869_p6), %vm647_vm1, %v3723_v2  ;;  %649 = vst.msk [vmem:[#allocation4 + $0x8] sm:$0xff] (!%p2869_p6), %vm647_vm1, %v3723_v2  ;;  %3074 = vmatprep.subr.bf16.mxu1 (!%p2869_p6), %v3722_v1  ;;  %v3410_v4 = vld [vmem:[%s3904_s18 + $0x10] sm:$0xff] (!%p2869_p6)   ;;  %vm3724_vm3 = vmmov (!%p2869_p6), 0   ;;  %v3411_v5 = vld [vmem:[%s3904_s18 + $0x8] sm:$0xff] (!%p2869_p6)   ;;  %vm546_vm4 = vcmask (!%p2869_p6), 261120  }
  0x3d   : > { %650 = vst.msk [vmem:[#allocation5] sm:$0xff] (!%p2869_p6), %vm647_vm1, %v3722_v1  ;;  %651 = vst.msk [vmem:[#allocation5 + $0x8] sm:$0xff] (!%p2869_p6), %vm647_vm1, %v3722_v1  ;;  %3070 = vmatprep.mubr.msk.bf16.mxu0 (!%p2869_p6), %vm3724_vm3, %v3722_v1  ;;  %3078 = vmatprep.mubr.msk.bf16.mxu1 (!%p2869_p6), %vm3724_vm3, %v3722_v1  ;;  %v3412_v6 = vld [vmem:[%s3904_s18 + $0x18] sm:$0xff] (!%p2869_p6)   ;;  %v524_v7 = vld [vmem:[#allocation2] sm:$0xff] (!%p2869_p6)  ;;  %vm644_vm5 = vcmask (!%p2869_p6), 125952  }
  0x3e   : > { %653 = vst.msk [vmem:[#allocation6] sm:$0xff] (!%p2869_p6), %vm652_vm2, %v3722_v1  ;;  %654 = vst.msk [vmem:[#allocation6 + $0x8] sm:$0xff] (!%p2869_p6), %vm652_vm2, %v3722_v1  ;;  %3067 = vmatpush3.bf16.msra.mxu0 (!%p2869_p6), %v3409_v3  ;;  %3075 = vmatpush3.bf16.msra.mxu1 (!%p2869_p6), %v3410_v4  ;;  %v525_v8 = vpack.c.bf16 (!%p2869_p6), %v524_v7, %v524_v7 }
  0x3f   : > { %3068 = vmatprep.subr.bf16.mxu0 (!%p2869_p6), %v3722_v1  ;;  %3076 = vmatprep.subr.bf16.mxu1 (!%p2869_p6), %v3722_v1 }
  0x42   : > { %3069 = vmatpush3.bf16.msra.mxu0 %v3411_v5  ;;  %3077 = vmatpush3.bf16.msra.mxu1 %v3412_v6 }
  0x45   : > { %3071 = vmatmul.mubr.msk.bf16.vlgmr.msra.gmra.mrb[0].mxu0 %vm546_vm4, %v525_v8  ;;  %3079 = vmatmul.mubr.msk.bf16.vlgmr.msra.gmra.mrb[0].mxu1 %vm546_vm4, %v525_v8 }
 0x118   : > { %v584_v9 = vpop.f32.mrb[0].mxu0  ;;  %v636_v11 = vpop.f32.mrb[0].mxu1 }
 0x119   : > { %v642_v10 = vpack.c.bf16 %v584_v9, %v584_v9  ;;  %v3072_v12 = vpop.f32.mrb[1].mxu0  ;;  %v643_v13 = vpack.c.bf16 %v636_v11, %v636_v11  ;;  %v3080_v14 = vpop.f32.mrb[1].mxu1 }
 0x11a   : > { %v587_v15 = vpop.f32.mrb[2].mxu0  ;;  %v639_v16 = vpop.f32.mrb[2].mxu1 }
 0x11b   : > { %645 = vst.msk [vmem:[#allocation3] sm:$0xf] %vm644_vm5, %v642_v10  ;;  %v3073_v17 = vpop.f32.mrb[3].mxu0  ;;  %646 = vst.msk [vmem:[#allocation3 + $0x4] sm:$0xf] %vm644_vm5, %v643_v13  ;;  %v3081_v18 = vpop.f32.mrb[3].mxu1 }
 0x11c PF: > { %v673_v19 = vld [vmem:[%s3892_s29 + $0x10] sm:$0xff]  ;;  %v671_v20 = vld [vmem:[%s3892_s29] sm:$0xff]  ;;  %v3725_v21 = vmov 0   ;;  %v674_v22 = vld [vmem:[%s3892_s29 + $0x18] sm:$0xff]  ;;  %vm811_vm6 = vcmask 261120   ;;  %vm3727_vm7 = vmmov 0  }
 0x11d   : > { %3414 = vset.pattern.permute.xlu1 %v3725_v21  ;;  %3413 = vset.pattern.permute.xlu0 %v3725_v21  ;;  %v672_v23 = vld [vmem:[%s3892_s29 + $0x8] sm:$0xff]  ;;  %v675_v25 = vld [vmem:[%s3892_s29 + $0x20] sm:$0xff]  ;;  %v3416_v27 = vld [vmem:[%s4865_s3 + $0x10] sm:$0xff]   ;;  %vm1302_vm8 = vcmask 130048   ;;  %vm1479_vm9 = vcmask 7168   ;;  %p2918_p7 = scmp.ne.s32.totalorder %s3704_s24, 1 }
 0x11e   : > { %699 = vperm.xlu1 %3414, %v673_v19   ;;  %689 = vperm.xlu0 %3413, %v671_v20   ;;  %v676_v24 = vld [vmem:[%s3892_s29 + $0x28] sm:$0xff]  ;;  %v3415_v26 = vld [vmem:[%s4865_s3] sm:$0xff]   ;;  %v678_v29 = vld [vmem:[%s3892_s29 + $0x38] sm:$0xff]  ;;  %vm3730_vm10 = vmmov (!%p2918_p7), 0  }
 0x11f   : > { %3082 = vmatprep.subr.bf16.mxu0 %v3415_v26  ;;  %3102 = vmatprep.subr.bf16.mxu1 %v3416_v27  ;;  %v3417_v28 = vld [vmem:[%s4865_s3 + $0x8] sm:$0xff]   ;;  %v3418_v30 = vld [vmem:[%s4865_s3 + $0x18] sm:$0xff]   ;;  %v677_v31 = vld [vmem:[%s3892_s29 + $0x30] sm:$0xff] }
 0x120   : > { %3083 = vmatpush3.bf16.msra.mxu0 %v3415_v26  ;;  %3103 = vmatpush3.bf16.msra.mxu1 %v3416_v27  ;;  %v680_v32 = vld [vmem:[%s3892_s29 + $0x48] sm:$0xff]  ;;  %v679_v33 = vld [vmem:[%s3892_s29 + $0x40] sm:$0xff]  ;;  %v682_v34 = vld [vmem:[%s3892_s29 + $0x58] sm:$0xff] }
 0x121   : > { %3084 = vmatprep.subr.bf16.mxu0 %v3417_v28  ;;  %3104 = vmatprep.subr.bf16.mxu1 %v3418_v30  ;;  %v681_v35 = vld [vmem:[%s3892_s29 + $0x50] sm:$0xff]  ;;  %v684_v36 = vld [vmem:[%s3892_s29 + $0x68] sm:$0xff]  ;;  %v683_v37 = vld [vmem:[%s3892_s29 + $0x60] sm:$0xff] }
 0x122   : > { %704 = vperm.xlu1 %3414, %v674_v22   ;;  %694 = vperm.xlu0 %3413, %v672_v23   ;;  %v686_v38 = vld [vmem:[%s3892_s29 + $0x78] sm:$0xff]  ;;  %v685_v39 = vld [vmem:[%s3892_s29 + $0x70] sm:$0xff]  ;;  %v3419_v40 = vld [vmem:[%s4866_s4] sm:$0xff]  }
 0x123   : > { %v3420_v41 = vld [vmem:[%s4866_s4 + $0x10] sm:$0xff]   ;;  %v655_v45 = vld [vmem:[%s3897_s23] sm:$0xff]  ;;  %v658_v46 = vld [vmem:[%s3897_s23 + $0x18] sm:$0xff] }
 0x124   : > { %3085 = vmatpush3.bf16.msra.mxu0 %v3417_v28  ;;  %3105 = vmatpush3.bf16.msra.mxu1 %v3418_v30  ;;  %v657_v44 = vld [vmem:[%s3897_s23 + $0x10] sm:$0xff]  ;;  %v656_v47 = vld [vmem:[%s3897_s23 + $0x8] sm:$0xff]  ;;  %v659_v55 = vld [vmem:[%s3897_s23 + $0x20] sm:$0xff] }
 0x125   : > { %3122 = vmatprep.subr.bf16.mxu0 %v3419_v40  ;;  %3142 = vmatprep.subr.bf16.mxu1 %v3420_v41  ;;  %v660_v54 = vld [vmem:[%s3897_s23 + $0x28] sm:$0xff]  ;;  %v3422_v61 = vld [vmem:[%s4866_s4 + $0x18] sm:$0xff]   ;;  %v661_v1 = vld [vmem:[%s3897_s23 + $0x30] sm:$0xff] }
 0x126   : > { %714 = vperm.xlu1 %3414, %v676_v24   ;;  %709 = vperm.xlu0 %3413, %v675_v25   ;;  %v3421_v60 = vld [vmem:[%s4866_s4 + $0x8] sm:$0xff]   ;;  %v662_v0 = vld [vmem:[%s3897_s23 + $0x38] sm:$0xff]  ;;  %v663_v8 = vld [vmem:[%s3897_s23 + $0x40] sm:$0xff] }
 0x127   : > { %v664_v7 = vld [vmem:[%s3897_s23 + $0x48] sm:$0xff]  ;;  %v666_v14 = vld [vmem:[%s3897_s23 + $0x58] sm:$0xff]  ;;  %v665_v15 = vld [vmem:[%s3897_s23 + $0x50] sm:$0xff] }
 0x128   : > { %v668_v21 = vld [vmem:[%s3897_s23 + $0x68] sm:$0xff]  ;;  %v667_v22 = vld [vmem:[%s3897_s23 + $0x60] sm:$0xff]  ;;  %v670_v28 = vld [vmem:[%s3897_s23 + $0x78] sm:$0xff] }
 0x12a   : > { %724 = vperm.xlu1 %3414, %v678_v29   ;;  %719 = vperm.xlu0 %3413, %v677_v31   ;;  %v669_v29 = vld [vmem:[%s3897_s23 + $0x70] sm:$0xff] }
 0x12e   : > { %734 = vperm.xlu1 %3414, %v680_v32   ;;  %729 = vperm.xlu0 %3413, %v679_v33  }
 0x132   : > { %744 = vperm.xlu1 %3414, %v682_v34   ;;  %739 = vperm.xlu0 %3413, %v681_v35  }
 0x136   : > { %754 = vperm.xlu1 %3414, %v684_v36   ;;  %749 = vperm.xlu0 %3413, %v683_v37   ;;  %v3726_v36 = vmov 0.0  }
 0x13a   : > { %764 = vperm.xlu1 %3414, %v686_v38   ;;  %759 = vperm.xlu0 %3413, %v685_v39  }
 0x19d   : > { %v700_v42 = vpop.permute.xlu1 %699  ;;  %v690_v43 = vpop.permute.xlu0 %689 }
 0x19e   : > { %v769_v50 = vmul.f32 %v700_v42, %v657_v44  ;;  %v767_v51 = vmul.f32 %v690_v43, %v655_v45 }
 0x1a1   : > { %v705_v48 = vpop.permute.xlu1 %704  ;;  %v695_v49 = vpop.permute.xlu0 %694 }
 0x1a2   : > { %v770_v52 = vmul.f32 %v705_v48, %v658_v46  ;;  %v768_v53 = vmul.f32 %v695_v49, %v656_v47 }
 0x1a4   : > { %v3975_v56 = vpack.c.bf16 %v770_v52, %v769_v50  ;;  %v3977_v57 = vpack.c.bf16 %v768_v53, %v767_v51 }
 0x1a5   : > { %v715_v58 = vpop.permute.xlu1 %714  ;;  %v710_v59 = vpop.permute.xlu0 %709 }
 0x1a6   : > { %v772_v62 = vmul.f32 %v715_v58, %v660_v54  ;;  %v771_v63 = vmul.f32 %v710_v59, %v659_v55  ;;  %3086 = vmatprep.mubr.msk.bf16.mxu0 %vm811_vm6, %v3977_v57  ;;  %3106 = vmatprep.mubr.msk.bf16.mxu1 %vm811_vm6, %v3977_v57 }
 0x1a7   : > { %3087 = vmatmul.mubr.msk.bf16.vlgmr.msra.gmra.mrb[0].mxu0 %vm811_vm6, %v3975_v56  ;;  %3107 = vmatmul.mubr.msk.bf16.vlgmr.msra.gmra.mrb[0].mxu1 %vm811_vm6, %v3975_v56 }
 0x1a8   : > { %v785_v2 = vpack.c.bf16 %v772_v62, %v771_v63  ;;  %3123 = vmatpush3.bf16.msra.mxu0 %v3419_v40  ;;  %3143 = vmatpush3.bf16.msra.mxu1 %v3420_v41 }
 0x1a9   : > { %v725_v3 = vpop.permute.xlu1 %724  ;;  %v720_v4 = vpop.permute.xlu0 %719  ;;  %3124 = vmatprep.subr.bf16.mxu0 %v3421_v60  ;;  %3144 = vmatprep.subr.bf16.mxu1 %v3422_v61 }
 0x1aa   : > { %v774_v5 = vmul.f32 %v725_v3, %v662_v0  ;;  %v773_v6 = vmul.f32 %v720_v4, %v661_v1  ;;  %3090 = vmatprep.mubr.msk.bf16.mxu0 %vm811_vm6, %v785_v2  ;;  %3110 = vmatprep.mubr.msk.bf16.mxu1 %vm811_vm6, %v785_v2 }
 0x1ac   : > { %v786_v9 = vpack.c.bf16 %v774_v5, %v773_v6  ;;  %3125 = vmatpush3.bf16.msra.mxu0 %v3421_v60  ;;  %3145 = vmatpush3.bf16.msra.mxu1 %v3422_v61 }
 0x1ad   : > { %v735_v10 = vpop.permute.xlu1 %734  ;;  %v730_v11 = vpop.permute.xlu0 %729  ;;  %3162 = vmatprep.subr.bf16.mxu0 %v3726_v36  ;;  %3182 = vmatprep.subr.bf16.mxu1 %v3726_v36 }
 0x1ae   : > { %v776_v12 = vmul.f32 %v735_v10, %v664_v7  ;;  %v775_v13 = vmul.f32 %v730_v11, %v663_v8 }
 0x1af   : > { %3091 = vmatmul.mubr.msk.bf16.gmra.mrb[4].mxu0 %vm811_vm6, %v786_v9  ;;  %3111 = vmatmul.mubr.msk.bf16.gmra.mrb[4].mxu1 %vm811_vm6, %v786_v9 }
 0x1b0   : > { %v787_v16 = vpack.c.bf16 %v776_v12, %v775_v13 }
 0x1b1   : > { %v745_v17 = vpop.permute.xlu1 %744  ;;  %v740_v18 = vpop.permute.xlu0 %739 }
 0x1b2   : > { %v778_v19 = vmul.f32 %v745_v17, %v666_v14  ;;  %v777_v20 = vmul.f32 %v740_v18, %v665_v15  ;;  %3094 = vmatprep.mubr.msk.bf16.mxu0 %vm811_vm6, %v787_v16  ;;  %3114 = vmatprep.mubr.msk.bf16.mxu1 %vm811_vm6, %v787_v16 }
 0x1b4   : > { %v788_v23 = vpack.c.bf16 %v778_v19, %v777_v20 }
 0x1b5   : > { %v755_v24 = vpop.permute.xlu1 %754  ;;  %v750_v25 = vpop.permute.xlu0 %749 }
 0x1b6   : > { %v780_v26 = vmul.f32 %v755_v24, %v668_v21  ;;  %v779_v27 = vmul.f32 %v750_v25, %v667_v22 }
 0x1b7   : > { %3095 = vmatmul.mubr.msk.bf16.gmra.mrb[8].mxu0 %vm811_vm6, %v788_v23  ;;  %3115 = vmatmul.mubr.msk.bf16.gmra.mrb[8].mxu1 %vm811_vm6, %v788_v23 }
 0x1b8   : > { %v789_v30 = vpack.c.bf16 %v780_v26, %v779_v27 }
 0x1b9   : > { %v765_v31 = vpop.permute.xlu1 %764  ;;  %v760_v32 = vpop.permute.xlu0 %759 }
 0x1ba   : > { %v782_v33 = vmul.f32 %v765_v31, %v670_v28  ;;  %v781_v34 = vmul.f32 %v760_v32, %v669_v29  ;;  %3098 = vmatprep.mubr.msk.bf16.mxu0 %vm811_vm6, %v789_v30  ;;  %3118 = vmatprep.mubr.msk.bf16.mxu1 %vm811_vm6, %v789_v30 }
 0x1bc   : > { %v790_v35 = vpack.c.bf16 %v782_v33, %v781_v34 }
 0x1bf   : > { %3099 = vmatmul.mubr.msk.bf16.gmra.mrb[12].mxu0 %vm811_vm6, %v790_v35  ;;  %3119 = vmatmul.mubr.msk.bf16.gmra.mrb[12].mxu1 %vm811_vm6, %v790_v35 }
 0x1c0   : > { %3126 = vmatprep.mubr.msk.bf16.mxu0 %vm811_vm6, %v3977_v57  ;;  %3146 = vmatprep.mubr.msk.bf16.mxu1 %vm811_vm6, %v3977_v57 }
 0x1c7   : > { %3127 = vmatmul.mubr.msk.bf16.vlgmr.msra.gmra.mrb[16].mxu0 %vm811_vm6, %v3975_v56  ;;  %3147 = vmatmul.mubr.msk.bf16.vlgmr.msra.gmra.mrb[16].mxu1 %vm811_vm6, %v3975_v56 }
 0x1c8   : > { %3130 = vmatprep.mubr.msk.bf16.mxu0 %vm811_vm6, %v785_v2  ;;  %3150 = vmatprep.mubr.msk.bf16.mxu1 %vm811_vm6, %v785_v2 }
 0x1cf   : > { %3131 = vmatmul.mubr.msk.bf16.gmra.mrb[20].mxu0 %vm811_vm6, %v786_v9  ;;  %3151 = vmatmul.mubr.msk.bf16.gmra.mrb[20].mxu1 %vm811_vm6, %v786_v9 }
 0x1d0   : > { %3134 = vmatprep.mubr.msk.bf16.mxu0 %vm811_vm6, %v787_v16  ;;  %3154 = vmatprep.mubr.msk.bf16.mxu1 %vm811_vm6, %v787_v16 }
 0x1d7   : > { %3135 = vmatmul.mubr.msk.bf16.gmra.mrb[24].mxu0 %vm811_vm6, %v788_v23  ;;  %3155 = vmatmul.mubr.msk.bf16.gmra.mrb[24].mxu1 %vm811_vm6, %v788_v23 }
 0x1d8   : > { %3138 = vmatprep.mubr.msk.bf16.mxu0 %vm811_vm6, %v789_v30  ;;  %3158 = vmatprep.mubr.msk.bf16.mxu1 %vm811_vm6, %v789_v30 }
 0x1df   : > { %3139 = vmatmul.mubr.msk.bf16.gmra.mrb[28].mxu0 %vm811_vm6, %v790_v35  ;;  %3159 = vmatmul.mubr.msk.bf16.gmra.mrb[28].mxu1 %vm811_vm6, %v790_v35 }
 0x1e0   : > { %3178 = vmatprep.mubr.msk.bf16.mxu0 %vm3727_vm7, %v3726_v36  ;;  %3198 = vmatprep.mubr.msk.bf16.mxu1 %vm3727_vm7, %v3726_v36 }
 0x27a   : > { %v3088_v37 = vpop.f32.mrb[0].mxu0  ;;  %v3108_v38 = vpop.f32.mrb[0].mxu1 }
 0x27b   : > { %v870_v39 = vpop.f32.mrb[1].mxu0  ;;  %v979_v40 = vpop.f32.mrb[1].mxu1 }
 0x27c   : > { %v3089_v41 = vpop.f32.mrb[2].mxu0  ;;  %v3109_v42 = vpop.f32.mrb[2].mxu1 }
 0x27d   : > { %v1043_v43 = vpack.c.bf16 %v3089_v41, %v3088_v37  ;;  %v1051_v44 = vpack.c.bf16 %v3109_v42, %v3108_v38  ;;  %v873_v45 = vpop.f32.mrb[3].mxu0  ;;  %v982_v46 = vpop.f32.mrb[3].mxu1 }
 0x27e   : > { %v1042_v47 = vpack.c.bf16 %v873_v45, %v870_v39  ;;  %v1050_v48 = vpack.c.bf16 %v982_v46, %v979_v40 }
 0x27f   : > { %v1310_v63 = vsel %vm1302_vm8, %v1043_v43, 0  ;;  %v1377_v0 = vsel %vm1302_vm8, %v1051_v44, 0 }
 0x280   : > { %v1307_v49 = vsel %vm1302_vm8, %v1042_v47, 0  ;;  %v1374_v50 = vsel %vm1302_vm8, %v1050_v48, 0 }
 0x281   : > { %3163 = vmatpush3.bf16.xpose.msra.mxu0 %v1307_v49  ;;  %3183 = vmatpush3.bf16.xpose.msra.mxu1 %v1374_v50 }
 0x282   : > { %v3092_v51 = vpop.f32.mrb[4].mxu0  ;;  %v3112_v52 = vpop.f32.mrb[4].mxu1  ;;  %3164 = vmatprep.subr.bf16.mxu0 %v3726_v36  ;;  %3184 = vmatprep.subr.bf16.mxu1 %v3726_v36 }
 0x283   : > { %v886_v53 = vpop.f32.mrb[5].mxu0  ;;  %v995_v54 = vpop.f32.mrb[5].mxu1 }
 0x284   : > { %v3093_v55 = vpop.f32.mrb[6].mxu0  ;;  %v3113_v56 = vpop.f32.mrb[6].mxu1 }
 0x285   : > { %v1045_v57 = vpack.c.bf16 %v3093_v55, %v3092_v51  ;;  %v1053_v58 = vpack.c.bf16 %v3113_v56, %v3112_v52  ;;  %v889_v59 = vpop.f32.mrb[7].mxu0  ;;  %v998_v60 = vpop.f32.mrb[7].mxu1 }
 0x286   : > { %v1044_v61 = vpack.c.bf16 %v889_v59, %v886_v53  ;;  %v1052_v62 = vpack.c.bf16 %v998_v60, %v995_v54 }
 0x287   : > { %v1316_v27 = vsel %vm1302_vm8, %v1045_v57, 0  ;;  %v1383_v28 = vsel %vm1302_vm8, %v1053_v58, 0 }
 0x288   : > { %v1313_v13 = vsel %vm1302_vm8, %v1044_v61, 0  ;;  %v1380_v14 = vsel %vm1302_vm8, %v1052_v62, 0 }
 0x289   : > { %3165 = vmatpush3.bf16.xpose.msra.mxu0 %v1310_v63  ;;  %3185 = vmatpush3.bf16.xpose.msra.mxu1 %v1377_v0 }
 0x28a   : > { %v4047_v1 = vpop.f32.mrb[8].mxu0  ;;  %v4049_v2 = vpop.f32.mrb[8].mxu1  ;;  %3166 = vmatprep.subr.bf16.mxu0 %v3726_v36  ;;  %3186 = vmatprep.subr.bf16.mxu1 %v3726_v36 }
 0x28b   : > { %v902_v3 = vpop.f32.mrb[9].mxu0  ;;  %v1011_v4 = vpop.f32.mrb[9].mxu1 }
 0x28c   : > { %v4053_v5 = vpop.f32.mrb[10].mxu0  ;;  %v4055_v6 = vpop.f32.mrb[10].mxu1 }
 0x28d   : > { %v1047_v7 = vpack.c.bf16 %v4053_v5, %v4047_v1  ;;  %v1055_v8 = vpack.c.bf16 %v4055_v6, %v4049_v2  ;;  %v905_v9 = vpop.f32.mrb[11].mxu0  ;;  %v1014_v10 = vpop.f32.mrb[11].mxu1 }
 0x28e   : > { %v1046_v11 = vpack.c.bf16 %v905_v9, %v902_v3  ;;  %v1054_v12 = vpack.c.bf16 %v1014_v10, %v1011_v4 }
 0x28f   : > { %v1322_v56 = vsel %vm1302_vm8, %v1047_v7, 0  ;;  %v1389_v57 = vsel %vm1302_vm8, %v1055_v8, 0 }
 0x290   : > { %v1319_v42 = vsel %vm1302_vm8, %v1046_v11, 0  ;;  %v1386_v43 = vsel %vm1302_vm8, %v1054_v12, 0 }
 0x291   : > { %3167 = vmatpush3.bf16.xpose.msra.mxu0 %v1313_v13  ;;  %3187 = vmatpush3.bf16.xpose.msra.mxu1 %v1380_v14 }
 0x292   : > { %v4063_v15 = vpop.f32.mrb[12].mxu0  ;;  %v4065_v16 = vpop.f32.mrb[12].mxu1  ;;  %3168 = vmatprep.subr.bf16.mxu0 %v3726_v36  ;;  %3188 = vmatprep.subr.bf16.mxu1 %v3726_v36 }
 0x293   : > { %v4069_v17 = vpop.f32.mrb[13].mxu0  ;;  %v4071_v18 = vpop.f32.mrb[13].mxu1 }
 0x294   : > { %v4073_v19 = vpop.f32.mrb[14].mxu0  ;;  %v4075_v20 = vpop.f32.mrb[14].mxu1 }
 0x295   : > { %v1049_v21 = vpack.c.bf16 %v4073_v19, %v4063_v15  ;;  %v1057_v22 = vpack.c.bf16 %v4075_v20, %v4065_v16  ;;  %v921_v23 = vpop.f32.mrb[15].mxu0  ;;  %v1030_v24 = vpop.f32.mrb[15].mxu1 }
 0x296   : > { %v1048_v25 = vpack.c.bf16 %v921_v23, %v4069_v17  ;;  %v1056_v26 = vpack.c.bf16 %v1030_v24, %v4071_v18 }
 0x298   : > { %v1325_v6 = vsel %vm1302_vm8, %v1048_v25, 0  ;;  %v1392_v7 = vsel %vm1302_vm8, %v1056_v26, 0  ;;  %v1328_v26 = vsel %vm1302_vm8, %v1049_v21, 0 }
 0x299   : > { %3169 = vmatpush3.bf16.xpose.msra.mxu0 %v1316_v27  ;;  %3189 = vmatpush3.bf16.xpose.msra.mxu1 %v1383_v28  ;;  %v1395_v27 = vsel %vm1302_vm8, %v1057_v22, 0  ;;  %v1300_v28 = vld [vmem:[#allocation3] sm:$0xf] }
 0x29a   : > { %v4085_v29 = vpop.f32.mrb[16].mxu0  ;;  %v4087_v30 = vpop.f32.mrb[16].mxu1  ;;  %3170 = vmatprep.subr.bf16.mxu0 %v3726_v36  ;;  %3190 = vmatprep.subr.bf16.mxu1 %v3726_v36 }
 0x29b   : > { %v4091_v31 = vpop.f32.mrb[17].mxu0  ;;  %v4093_v32 = vpop.f32.mrb[17].mxu1 }
 0x29c   : > { %v4095_v33 = vpop.f32.mrb[18].mxu0  ;;  %v4097_v34 = vpop.f32.mrb[18].mxu1 }
 0x29d   : > { %v1285_v35 = vpack.c.bf16 %v4095_v33, %v4085_v29  ;;  %v1293_v37 = vpack.c.bf16 %v4097_v34, %v4087_v30  ;;  %v4103_v38 = vpop.f32.mrb[19].mxu0  ;;  %v4105_v39 = vpop.f32.mrb[19].mxu1  ;;  %v1440_v33 = vld [vmem:[#allocation4 + $0x8] sm:$0xff]  ;;  %v1439_v34 = vld [vmem:[#allocation4] sm:$0xff] }
 0x29e   : > { %v1284_v40 = vpack.c.bf16 %v4103_v38, %v4091_v31  ;;  %v1292_v41 = vpack.c.bf16 %v4105_v39, %v4093_v32 }
 0x2a1   : > { %3171 = vmatpush3.bf16.xpose.msra.mxu0 %v1319_v42  ;;  %3191 = vmatpush3.bf16.xpose.msra.mxu1 %v1386_v43  ;;  %v1301_v42 = vld [vmem:[#allocation3 + $0x4] sm:$0xf] }
 0x2a2   : > { %v4113_v44 = vpop.f32.mrb[20].mxu0  ;;  %v4115_v45 = vpop.f32.mrb[20].mxu1  ;;  %3172 = vmatprep.subr.bf16.mxu0 %v3726_v36  ;;  %3192 = vmatprep.subr.bf16.mxu1 %v3726_v36 }
 0x2a3   : > { %v4119_v46 = vpop.f32.mrb[21].mxu0  ;;  %v4121_v47 = vpop.f32.mrb[21].mxu1 }
 0x2a4   : > { %v4123_v48 = vpop.f32.mrb[22].mxu0  ;;  %v4125_v49 = vpop.f32.mrb[22].mxu1 }
 0x2a5   : > { %v1287_v50 = vpack.c.bf16 %v4123_v48, %v4113_v44  ;;  %v1295_v51 = vpack.c.bf16 %v4125_v49, %v4115_v45  ;;  %v1131_v52 = vpop.f32.mrb[23].mxu0  ;;  %v1240_v53 = vpop.f32.mrb[23].mxu1 }
 0x2a6   : > { %v1286_v54 = vpack.c.bf16 %v1131_v52, %v4119_v46  ;;  %v1294_v55 = vpack.c.bf16 %v1240_v53, %v4121_v47 }
 0x2a9   : > { %3173 = vmatpush3.bf16.xpose.msra.mxu0 %v1322_v56  ;;  %3193 = vmatpush3.bf16.xpose.msra.mxu1 %v1389_v57  ;;  %v1470_v56 = vld [vmem:[#allocation5 + $0x8] sm:$0xff]  ;;  %v1469_v57 = vld [vmem:[#allocation5] sm:$0xff] }
 0x2aa   : > { %v4135_v58 = vpop.f32.mrb[24].mxu0  ;;  %v4137_v59 = vpop.f32.mrb[24].mxu1  ;;  %3174 = vmatprep.subr.bf16.mxu0 %v3726_v36  ;;  %3194 = vmatprep.subr.bf16.mxu1 %v3726_v36 }
 0x2ab   : > { %v1144_v60 = vpop.f32.mrb[25].mxu0  ;;  %v1253_v61 = vpop.f32.mrb[25].mxu1 }
 0x2ac   : > { %v3137_v62 = vpop.f32.mrb[26].mxu0  ;;  %v3157_v63 = vpop.f32.mrb[26].mxu1 }
 0x2ad   : > { %v1289_v0 = vpack.c.bf16 %v3137_v62, %v4135_v58  ;;  %v1297_v1 = vpack.c.bf16 %v3157_v63, %v4137_v59  ;;  %v1147_v2 = vpop.f32.mrb[27].mxu0  ;;  %v1256_v3 = vpop.f32.mrb[27].mxu1 }
 0x2ae   : > { %v1288_v4 = vpack.c.bf16 %v1147_v2, %v1144_v60  ;;  %v1296_v5 = vpack.c.bf16 %v1256_v3, %v1253_v61  ;;  %v1482_v2 = vld [vmem:[#allocation6] sm:$0xff] }
 0x2b1   : > { %3175 = vmatpush3.bf16.xpose.msra.mxu0 %v1325_v6  ;;  %3195 = vmatpush3.bf16.xpose.msra.mxu1 %v1392_v7 }
 0x2b2   : > { %v3140_v8 = vpop.f32.mrb[28].mxu0  ;;  %v3160_v9 = vpop.f32.mrb[28].mxu1  ;;  %3176 = vmatprep.subr.bf16.mxu0 %v3726_v36  ;;  %3196 = vmatprep.subr.bf16.mxu1 %v3726_v36 }
 0x2b3   : > { %v1160_v10 = vpop.f32.mrb[29].mxu0  ;;  %v1269_v11 = vpop.f32.mrb[29].mxu1 }
 0x2b4   : > { %v3141_v12 = vpop.f32.mrb[30].mxu0  ;;  %v3161_v13 = vpop.f32.mrb[30].mxu1 }
 0x2b5   : > { %v1291_v14 = vpack.c.bf16 %v3141_v12, %v3140_v8  ;;  %v1299_v17 = vpack.c.bf16 %v3161_v13, %v3160_v9  ;;  %v1163_v18 = vpop.f32.mrb[31].mxu0  ;;  %v1272_v23 = vpop.f32.mrb[31].mxu1 }
 0x2b6   : > { %v1290_v24 = vpack.c.bf16 %v1163_v18, %v1160_v10  ;;  %v1298_v25 = vpack.c.bf16 %v1272_v23, %v1269_v11 }
 0x2b9   : > { %3177 = vmatpush3.bf16.xpose.msra.mxu0 %v1328_v26  ;;  %3197 = vmatpush3.bf16.xpose.msra.mxu1 %v1395_v27  ;;  %v3432_v26 = vld [vmem:[%s3909_s9] sm:$0xff] (!%p2918_p7)   ;;  %v3729_v27 = vmov (!%p2918_p7), 0.0  }
 0x2ba   : > { %3202 = vmatprep.subr.bf16.mxu0 %v3726_v36  ;;  %3222 = vmatprep.subr.bf16.mxu1 %v3726_v36 }
 0x2c0   : > { %3179 = vmatmul.mubr.msk.bf16.vlgmr.msra.gmra.mrb[32].mxu0 %vm1302_vm8, %v1300_v28  ;;  %3199 = vmatmul.mubr.msk.bf16.vlgmr.msra.gmra.mrb[32].mxu1 %vm1302_vm8, %v1301_v42  ;;  %v3433_v42 = vld [vmem:[%s3909_s9 + $0x8] sm:$0xff] (!%p2918_p7)  }
 0x2c1   : > { %3203 = vmatpush3.bf16.msra.mxu0 %v1284_v40  ;;  %3223 = vmatpush3.bf16.msra.mxu1 %v1292_v41 }
 0x2c2   : > { %3204 = vmatprep.subr.bf16.mxu0 %v3726_v36  ;;  %3224 = vmatprep.subr.bf16.mxu1 %v3726_v36 }
 0x2c3   : > { %3218 = vmatprep.mubr.msk.bf16.mxu0 %vm3727_vm7, %v3726_v36  ;;  %3238 = vmatprep.mubr.msk.bf16.mxu1 %vm3727_vm7, %v3726_v36 }
 0x2c5   : > { %3205 = vmatpush3.bf16.msra.mxu0 %v1285_v35  ;;  %3225 = vmatpush3.bf16.msra.mxu1 %v1293_v37 }
 0x2c6   : > { %3206 = vmatprep.subr.bf16.mxu0 %v3726_v36  ;;  %3226 = vmatprep.subr.bf16.mxu1 %v3726_v36 }
 0x2c9   : > { %3207 = vmatpush3.bf16.msra.mxu0 %v1286_v54  ;;  %3227 = vmatpush3.bf16.msra.mxu1 %v1294_v55 }
 0x2ca   : > { %3208 = vmatprep.subr.bf16.mxu0 %v3726_v36  ;;  %3228 = vmatprep.subr.bf16.mxu1 %v3726_v36 }
 0x2cd   : > { %3209 = vmatpush3.bf16.msra.mxu0 %v1287_v50  ;;  %3229 = vmatpush3.bf16.msra.mxu1 %v1295_v51 }
 0x2ce   : > { %3210 = vmatprep.subr.bf16.mxu0 %v3726_v36  ;;  %3230 = vmatprep.subr.bf16.mxu1 %v3726_v36 }
 0x2d1   : > { %3211 = vmatpush3.bf16.msra.mxu0 %v1288_v4  ;;  %3231 = vmatpush3.bf16.msra.mxu1 %v1296_v5 }
 0x2d2   : > { %3212 = vmatprep.subr.bf16.mxu0 %v3726_v36  ;;  %3232 = vmatprep.subr.bf16.mxu1 %v3726_v36 }
 0x2d5   : > { %3213 = vmatpush3.bf16.msra.mxu0 %v1289_v0  ;;  %3233 = vmatpush3.bf16.msra.mxu1 %v1297_v1  ;;  %v1483_v0 = vld [vmem:[#allocation6 + $0x8] sm:$0xff] }
 0x2d6   : > { %3214 = vmatprep.subr.bf16.mxu0 %v3726_v36  ;;  %3234 = vmatprep.subr.bf16.mxu1 %v3726_v36 }
 0x2d9   : > { %3215 = vmatpush3.bf16.msra.mxu0 %v1290_v24  ;;  %3235 = vmatpush3.bf16.msra.mxu1 %v1298_v25  ;;  %v3728_v24 = vmov (!%p2918_p7), 0  }
 0x2da   : > { %3216 = vmatprep.subr.bf16.mxu0 %v3726_v36  ;;  %3236 = vmatprep.subr.bf16.mxu1 %v3726_v36 }
 0x2dd   : > { %3217 = vmatpush3.bf16.msra.mxu0 %v1291_v14  ;;  %3237 = vmatpush3.bf16.msra.mxu1 %v1299_v17 }
 0x2de   : > { %3242 = vmatprep.subr.bf16.mxu0 (!%p2918_p7), %v3729_v27  ;;  %3248 = vmatprep.subr.bf16.mxu1 (!%p2918_p7), %v3729_v27 }
 0x393   : > { %v1364_v15 = vpop.f32.mrb[32].mxu0  ;;  %v1431_v16 = vpop.f32.mrb[32].mxu1 }
 0x394   : > { %v1437_v19 = vmul.f32 0.25, %v1364_v15  ;;  %v1438_v20 = vmul.f32 0.25, %v1431_v16  ;;  %v3180_v21 = vpop.f32.mrb[33].mxu0  ;;  %v3200_v22 = vpop.f32.mrb[33].mxu1 }
 0x395   : > { %v1367_v29 = vpop.f32.mrb[34].mxu0  ;;  %v1434_v30 = vpop.f32.mrb[34].mxu1 }
 0x396   : > { %1443 = vmax.xlane.f32.xlu1 %v1438_v20  ;;  %v3201_v31 = vpop.f32.mrb[35].mxu1  ;;  %1441 = vmax.xlane.f32.xlu0 %v1437_v19  ;;  %v3181_v32 = vpop.f32.mrb[35].mxu0 }
 0x423   : > { %v1444_v35 = vpop.xlane.xlu1 %1443  ;;  %v1442_v37 = vpop.xlane.xlu0 %1441 }
 0x424   : > { %v1446_v36 = vmax.f32 %v1440_v33, %v1444_v35  ;;  %v1445_v38 = vmax.f32 %v1439_v34, %v1442_v37 }
 0x426   : > { %v1448_v39 = vsub.f32 %v1440_v33, %v1446_v36  ;;  %1583 = vst.msk [vmem:[#allocation4 + $0x8] sm:$0xff] %vm1479_vm9, %v1446_v36  ;;  %v1447_v40 = vsub.f32 %v1439_v34, %v1445_v38  ;;  %1582 = vst.msk [vmem:[#allocation4] sm:$0xff] %vm1479_vm9, %v1445_v38  ;;  %1460 = vperm.xlu1 %3414, %v1446_v36   ;;  %1455 = vperm.xlu0 %3413, %v1445_v38   ;;  %v2923_v38 = vld [vmem:[%s500_s1] ss:$0 sm:$0xff] (!%p2918_p7) }
 0x428   : > { %v1451_v52 = vmul.f32 1.442695, %v1448_v39  ;;  %v1449_v53 = vmul.f32 1.442695, %v1447_v40 }
 0x4a5   : > { %v1461_v41 = vpop.permute.xlu1 %1460  ;;  %v1456_v43 = vpop.permute.xlu0 %1455 }
 0x4a6   : > { %v1464_v44 = vsub.f32 %v1438_v20, %v1461_v41  ;;  %v1463_v45 = vsub.f32 %v1437_v19, %v1456_v43 }
 0x4a8   : > { %v1467_v46 = vmul.f32 1.442695, %v1464_v44  ;;  %v1465_v47 = vmul.f32 1.442695, %v1463_v45  ;;  %v1721_v44 = vld [vmem:[#allocation2] sm:$0xff] (!%p2918_p7) }
 0x4aa   : > { %3423 = vpow2.f32 %v1467_v46 }
 0x4ab   : > { %3425 = vpow2.f32 %v1465_v47 }
 0x4ac   : > { %3427 = vpow2.f32 %v1451_v52 }
 0x4ad   : > { %3429 = vpow2.f32 %v1449_v53 }
 0x4b4   : > { %v3424_v48 = vpop.eup %3423 }
 0x4b5   : > { %v3426_v49 = vpop.eup %3425  ;;  %1475 = vadd.xlane.f32.xlu1 %v3424_v48  ;;  %v1497_v50 = vpack.c.bf16 %v3424_v48, %v3424_v48 }
 0x4b6   : > { %1473 = vadd.xlane.f32.xlu0 %v3426_v49  ;;  %v1496_v51 = vpack.c.bf16 %v3426_v49, %v3426_v49  ;;  %v3428_v54 = vpop.eup %3427 }
 0x4b7   : > { %3239 = vmatmul.mubr.bf16.vlgmr.msra.gmra.mrb[36].mxu1 %v1497_v50  ;;  %v3430_v55 = vpop.eup %3429  ;;  %v1472_v58 = vmul.f32 %v3428_v54, %v1470_v56 }
 0x4b8   : > { %3219 = vmatmul.mubr.bf16.vlgmr.msra.gmra.mrb[36].mxu0 %v1496_v51  ;;  %v1471_v60 = vmul.f32 %v3430_v55, %v1469_v57  ;;  %3250 = vmatprep.mubr.msk.bf16.mxu1 (!%p2918_p7), %vm3730_vm10, %v3729_v27 }
 0x4b9   : > { %3243 = vmatpush3.bf16.msra.mxu0 (!%p2918_p7), %v3432_v26  ;;  %3244 = vmatprep.mubr.msk.bf16.mxu0 (!%p2918_p7), %vm3730_vm10, %v3729_v27 }
 0x4ba   : > { %3249 = vmatpush3.bf16.msra.mxu1 (!%p2918_p7), %v3433_v42 }
 0x4c6   : > { %1491 = vperm.xlu1 %3414, %v3428_v54  }
 0x4cc   : > { %1486 = vperm.xlu0 %3413, %v3430_v55  }
 0x4d0   : > { %3431 = vset.pattern.permute.xlu0 (!%p2918_p7), %v3728_v24 }
 0x542   : > { %v1476_v59 = vpop.xlane.xlu1 %1475 }
 0x543   : > { %v1478_v61 = vadd.f32 %v1476_v59, %v1472_v58  ;;  %v1474_v62 = vpop.xlane.xlu0 %1473 }
 0x544   : > { %v1477_v63 = vadd.f32 %v1474_v62, %v1471_v60 }
 0x545   : > { %1481 = vst.msk [vmem:[#allocation5 + $0x8] sm:$0xff] %vm1479_vm9, %v1478_v61 }
 0x546   : > { %1480 = vst.msk [vmem:[#allocation5] sm:$0xff] %vm1479_vm9, %v1477_v63  ;;  %v1492_v1 = vpop.permute.xlu1 %1491 }
 0x547   : > { %v1495_v4 = vmul.f32 %v1492_v1, %v1483_v0 }
 0x54b   : > { %v1487_v3 = vpop.permute.xlu0 %1486 }
 0x54c   : > { %v1494_v5 = vmul.f32 %v1487_v3, %v1482_v2  ;;  %v1591_v23 = vld [vmem:[#allocation5 + $0x8] sm:$0xff] (!%p2918_p7) }
 0x54d   : > { %v1590_v18 = vld [vmem:[#allocation5] sm:$0xff] (!%p2918_p7) }
 0x54e   : > { %3434 = vrcp.f32 (!%p2918_p7), %v1590_v18 }
 0x54f   : > { %3436 = vrcp.f32 (!%p2918_p7), %v1591_v23 }
 0x558   : > { %v3435_v25 = vpop.eup (!%p2918_p7), %3434 }
 0x559   : > { %1596 = vperm.xlu0 (!%p2918_p7), %3431, %v3435_v25   ;;  %v3437_v28 = vpop.eup (!%p2918_p7), %3436 }
 0x55d   : > { %1601 = vperm.xlu0 (!%p2918_p7), %3431, %v3437_v28  }
 0x588   : > { %1587 = sbr.rel (%p2918_p7) target bundleno = 2034 (0x7f2), region = 68 }
 0x58a   : > { %v1572_v6 = vpop.f32.mrb[36].mxu1 }
 0x58b   : > { %v1532_v7 = vpop.f32.mrb[36].mxu0  ;;  %v1579_v8 = vadd.f32 %v1572_v6, %v1495_v4  ;;  %v3240_v9 = vpop.f32.mrb[37].mxu1 }
 0x58c   : > { %v1578_v10 = vadd.f32 %v1532_v7, %v1494_v5  ;;  %v3220_v11 = vpop.f32.mrb[37].mxu0  ;;  %v1575_v12 = vpop.f32.mrb[38].mxu1 }
 0x58d   : > { %1581 = vst.msk [vmem:[#allocation6 + $0x8] sm:$0xff] %vm1302_vm8, %v1579_v8  ;;  %v1535_v13 = vpop.f32.mrb[38].mxu0  ;;  %v3241_v14 = vpop.f32.mrb[39].mxu1 }
 0x58e   : > { %1580 = vst.msk [vmem:[#allocation6] sm:$0xff] %vm1302_vm8, %v1578_v10  ;;  %v3221_v17 = vpop.f32.mrb[39].mxu0 }
 0x594   : > { %v1589_v20 = vld [vmem:[#allocation6 + $0x8] sm:$0xff] }
 0x595   : > { %v1588_v15 = vld [vmem:[#allocation6] sm:$0xff] }
 0x5d8   : > { %v1597_v16 = vpop.permute.xlu0 %1596 }
 0x5d9   : > { %v1604_v19 = vmul.f32 %v1597_v16, %v1588_v15 }
 0x5db   : > { %v1606_v21 = vpack.c.bf16 %v1604_v19, %v1604_v19 }
 0x5dc   : > { %v1602_v22 = vpop.permute.xlu0 %1601 }
 0x5dd   : > { %v1605_v29 = vmul.f32 %v1602_v22, %v1589_v20  ;;  %3245 = vmatmul.mubr.msk.bf16.vlgmr.msra.gmra.mrb[0].mxu0 %vm1302_vm8, %v1606_v21 }
 0x5df   : > { %v1607_v30 = vpack.c.bf16 %v1605_v29, %v1605_v29 }
 0x5e1   : > { %3251 = vmatmul.mubr.msk.bf16.vlgmr.msra.gmra.mrb[0].mxu1 %vm1302_vm8, %v1607_v30 }
 0x6b0   : > { %v1655_v31 = vpop.f32.mrb[0].mxu0 }
 0x6b1   : > { %v3246_v32 = vpop.f32.mrb[1].mxu0  ;;  %v1710_v37 = vsel %vm811_vm6, %v1655_v31, 0.0 }
 0x6b2   : > { %v1658_v33 = vpop.f32.mrb[2].mxu0 }
 0x6b3   : > { %v3247_v34 = vpop.f32.mrb[3].mxu0 }
 0x6b4   : > { %v1704_v35 = vpop.f32.mrb[0].mxu1 }
 0x6b5   : > { %v1711_v36 = vsel %vm811_vm6, %v1704_v35, 0.0  ;;  %v3252_v39 = vpop.f32.mrb[1].mxu1 }
 0x6b6   : > { %v1712_v40 = vadd.f32 %v1711_v36, %v1710_v37  ;;  %v1707_v41 = vpop.f32.mrb[2].mxu1 }
 0x6b7   : > { %v3253_v43 = vpop.f32.mrb[3].mxu1 }
 0x6b8   : > { %v1720_v45 = vadd.f32 %v2923_v38, %v1712_v40 }
 0x6ba   : > { %v1722_v46 = vadd.f32 %v1721_v44, %v1720_v45 }
 0x6bc   : > { %v1723_v47 = vsel %vm811_vm6, %v1722_v46, 0.0 }
 0x6bd   : > { %1724 = vadd.xlane.f32.xlu1 %v1723_v47 }
 0x74a   : > { %v1725_v48 = vpop.xlane.xlu1 %1724 }
 0x74b   : > { %v1727_v49 = vmul.f32 0.03125, %v1725_v48 }
 0x74d   : > { %v1728_v50 = vsub.f32 %v1722_v46, %v1727_v49 }
 0x74f   : > { %v1729_v51 = vmul.f32 %v1728_v50, %v1728_v50 }
 0x751   : > { %v1730_v52 = vsel %vm811_vm6, %v1729_v51, 0.0 }
 0x752   : > { %1731 = vadd.xlane.f32.xlu1 %v1730_v52 }
 0x7df   : > { %v1732_v53 = vpop.xlane.xlu1 %1731 }
 0x7e0   : > { %v1733_v54 = vmul.f32 0.03125, %v1732_v53 }
 0x7e2   : > { %v1734_v55 = vadd.f32 1e-05, %v1733_v54 }
 0x7e4   : > { %3438 = vrsqrt.f32 %v1734_v55 }
 0x7ee   : > { %v3439_v56 = vpop.eup %3438 }
 0x7ef   : > { %v1736_v57 = vmul.f32 %v3439_v56, %v1728_v50 }
 0x7f1   : > { %1737 = vst.msk [vmem:[#allocation2] sm:$0xff] %vm811_vm6, %v1736_v57 }
 0x7f2 PF: > { %p2924_p9 = scmp.ne.s32.totalorder %s3708_s25, 2 }
 0x7f4   : > { %1741 = sbr.rel (%p2924_p9) target bundleno = 3045 (0xbe5), region = 72 }
 0x7fb   : > { %v4217_v58 = vld [vmem:[#allocation2] sm:$0xff]  ;;  %vm1775_vm11 = vcmask 261120   ;;  %v4223_v60 = vld [vmem:[%s3897_s23 + $0x8] sm:$0xff]  ;;  %v4237_v0 = vld [vmem:[%s3897_s23 + $0x10] sm:$0xff]  ;;  %vm2111_vm12 = vcmask 64512   ;;  %vm2320_vm13 = vcmask 1043456  }
 0x7fc   : > { %v4220_v59 = vld [vmem:[%s3897_s23] sm:$0xff]  ;;  %4918 = vst [vmem:[#allocation28_spill] sm:$0xff] %v4223_v60  ;;  %v4227_v61 = vpack.c.bf16 %v4217_v58, %v4217_v58  ;;  %4919 = vst [vmem:[#allocation29_spill] sm:$0xff] %v4237_v0  ;;  %v4240_v1 = vld [vmem:[%s3897_s23 + $0x18] sm:$0xff]  ;;  %vm3732_vm14 = vmmov 0   ;;  %p2942_p10 = scmp.ne.s32.totalorder %s3704_s24, 0 }
 0x7fd   : > { %4917 = vst [vmem:[#allocation27_spill] sm:$0xff] %v4220_v59  ;;  %v1962_v62 = vpack.c.bf16 %v4223_v60, %v4220_v59  ;;  %v4243_v2 = vld [vmem:[%s3897_s23 + $0x20] sm:$0xff]  ;;  %v4246_v3 = vld [vmem:[%s3897_s23 + $0x28] sm:$0xff]  ;;  %v1963_v4 = vpack.c.bf16 %v4240_v1, %v4237_v0  ;;  %v4255_v6 = vld [vmem:[%s3897_s23 + $0x30] sm:$0xff]  ;;  %vm2487_vm15 = vcmask (!%p2942_p10), 0  }
 0x7fe   : > { %3310 = vmatprep.subr.msk.bf16.mxu1 %vm1775_vm11, %v4227_v61  ;;  %v1996_v63 = vsel %vm1775_vm11, %v4227_v61, 0  ;;  %v1964_v5 = vpack.c.bf16 %v4246_v3, %v4243_v2  ;;  %v4258_v7 = vld [vmem:[%s3897_s23 + $0x38] sm:$0xff]  ;;  %v4261_v8 = vld [vmem:[%s3897_s23 + $0x40] sm:$0xff]  ;;  %v4264_v9 = vld [vmem:[%s3897_s23 + $0x48] sm:$0xff] }
 0x7ff   : > { %3276 = vmatprep.mubr.msk.bf16.mxu1 %vm1775_vm11, %v1962_v62  ;;  %3275 = vmatpush3.bf16.xpose.msra.mxu1 %v1996_v63  ;;  %v1965_v10 = vpack.c.bf16 %v4258_v7, %v4255_v6  ;;  %v1966_v11 = vpack.c.bf16 %v4264_v9, %v4261_v8  ;;  %v4273_v12 = vld [vmem:[%s3897_s23 + $0x50] sm:$0xff]  ;;  %v4276_v13 = vld [vmem:[%s3897_s23 + $0x58] sm:$0xff]  ;;  %v4279_v14 = vld [vmem:[%s3897_s23 + $0x60] sm:$0xff] }
 0x800   : > { %v4282_v17 = vld [vmem:[%s3897_s23 + $0x68] sm:$0xff]  ;;  %v1967_v18 = vpack.c.bf16 %v4276_v13, %v4273_v12  ;;  %v4291_v24 = vld [vmem:[%s3897_s23 + $0x70] sm:$0xff]  ;;  %v4294_v25 = vld [vmem:[%s3897_s23 + $0x78] sm:$0xff]  ;;  %3311 = vmatprep.subr.msk.bf16.mxu1 %vm2320_vm13, %v4227_v61 }
 0x801   : > { %v1968_v23 = vpack.c.bf16 %v4282_v17, %v4279_v14  ;;  %v1969_v26 = vpack.c.bf16 %v4294_v25, %v4291_v24 }
 0x806   : > { %3277 = vmatmul.mubr.msk.bf16.vlgmr.msra.gmra.mrb[0].mxu1 %vm1775_vm11, %v1963_v4 }
 0x807   : > { %3280 = vmatprep.mubr.msk.bf16.mxu1 %vm1775_vm11, %v1964_v5 }
 0x80e   : > { %3281 = vmatmul.mubr.msk.bf16.gmra.mrb[4].mxu1 %vm1775_vm11, %v1965_v10 }
 0x80f   : > { %3284 = vmatprep.mubr.msk.bf16.mxu1 %vm1775_vm11, %v1966_v11 }
 0x816   : > { %3285 = vmatmul.mubr.msk.bf16.gmra.mrb[8].mxu1 %vm1775_vm11, %v1967_v18 }
 0x817   : > { %3288 = vmatprep.mubr.msk.bf16.mxu1 %vm1775_vm11, %v1968_v23 }
 0x81e   : > { %3289 = vmatmul.mubr.msk.bf16.gmra.mrb[12].mxu1 %vm1775_vm11, %v1969_v26 }
 0x8d9   : > { %v3278_v27 = vpop.f32.mrb[0].mxu1 }
 0x8da   : > { %v4299_v28 = vmul.f32 0.17677669, %v3278_v27  ;;  %v2032_v42 = vpop.f32.mrb[1].mxu1 }
 0x8db   : > { %v4301_v15 = vmul.f32 0.17677669, %v2032_v42  ;;  %v3279_v16 = vpop.f32.mrb[2].mxu1  ;;  %v1759_v42 = vmul.f32 %v4220_v59, %v4220_v59 }
 0x8dc   : > { %v4303_v19 = vmul.f32 0.17677669, %v3279_v16  ;;  %v2035_v20 = vpop.f32.mrb[3].mxu1  ;;  %v2118_v21 = vsel %vm2111_vm12, %v4299_v28, -inf }
 0x8dd   : > { %v4307_v22 = vmul.f32 0.17677669, %v2035_v20  ;;  %2119 = vmax.xlane.f32.xlu1 %v2118_v21  ;;  %v2112_v29 = vsel %vm2111_vm12, %v4301_v15, -inf  ;;  %v1760_v20 = vmul.f32 %v4223_v60, %v4223_v60  ;;  %v1776_v21 = vsel %vm1775_vm11, %v1759_v42, 0.0 }
 0x8de   : > { %2113 = vmax.xlane.f32.xlu0 %v2112_v29  ;;  %v2121_v30 = vsel %vm2111_vm12, %v4303_v19, -inf  ;;  %v1761_v29 = vmul.f32 %v4237_v0, %v4237_v0 }
 0x8df   : > { %v2115_v32 = vsel %vm2111_vm12, %v4307_v22, -inf }
 0x8e1   : > { %2122 = vmax.xlane.f32.xlu1 %v2121_v30  ;;  %v3282_v31 = vpop.f32.mrb[4].mxu1  ;;  %v1779_v30 = vsel %vm1775_vm11, %v1760_v20, 0.0  ;;  %v2321_v20 = vsel %vm2320_vm13, %v4227_v61, 0 }
 0x8e2   : > { %2116 = vmax.xlane.f32.xlu0 %v2115_v32  ;;  %v2048_v33 = vpop.f32.mrb[5].mxu1  ;;  %v4317_v36 = vmul.f32 0.17677669, %v3282_v31  ;;  %v1762_v31 = vmul.f32 %v4240_v1, %v4240_v1  ;;  %v1782_v32 = vsel %vm1775_vm11, %v1761_v29, 0.0  ;;  %3293 = vmatpush3.bf16.msra.mxu1 %v2321_v20 }
 0x8e3   : > { %v4315_v34 = vmul.f32 0.17677669, %v2048_v33  ;;  %v3283_v35 = vpop.f32.mrb[6].mxu1  ;;  %v1763_v33 = vmul.f32 %v4243_v2, %v4243_v2 }
 0x8e4   : > { %v2051_v37 = vpop.f32.mrb[7].mxu1  ;;  %v4323_v40 = vmul.f32 0.17677669, %v3283_v35  ;;  %v2130_v44 = vsel %vm2111_vm12, %v4317_v36, -inf  ;;  %v1785_v35 = vsel %vm1775_vm11, %v1762_v31, 0.0 }
 0x8e5   : > { %v4319_v38 = vmul.f32 0.17677669, %v2051_v37  ;;  %v2124_v39 = vsel %vm2111_vm12, %v4315_v34, -inf  ;;  %v1764_v37 = vmul.f32 %v4246_v3, %v4246_v3 }
 0x8e6   : > { %2125 = vmax.xlane.f32.xlu0 %v2124_v39  ;;  %v2133_v49 = vsel %vm2111_vm12, %v4323_v40, -inf  ;;  %v1788_v39 = vsel %vm1775_vm11, %v1763_v33, 0.0 }
 0x8e7   : > { %v2127_v41 = vsel %vm2111_vm12, %v4319_v38, -inf }
 0x8e8   : > { %2128 = vmax.xlane.f32.xlu1 %v2127_v41  ;;  %v1765_v41 = vmul.f32 %v4255_v6, %v4255_v6 }
 0x8e9   : > { %v3286_v43 = vpop.f32.mrb[8].mxu1 }
 0x8ea   : > { %2131 = vmax.xlane.f32.xlu0 %v2130_v44  ;;  %v2064_v45 = vpop.f32.mrb[9].mxu1  ;;  %v4329_v46 = vmul.f32 0.17677669, %v3286_v43  ;;  %v1791_v43 = vsel %vm1775_vm11, %v1764_v37, 0.0  ;;  %v1766_v44 = vmul.f32 %v4258_v7, %v4258_v7 }
 0x8eb   : > { %v4331_v47 = vmul.f32 0.17677669, %v2064_v45  ;;  %v3287_v48 = vpop.f32.mrb[10].mxu1  ;;  %v1794_v45 = vsel %vm1775_vm11, %v1765_v41, 0.0 }
 0x8ec   : > { %2134 = vmax.xlane.f32.xlu1 %v2133_v49  ;;  %v2067_v50 = vpop.f32.mrb[11].mxu1  ;;  %v4335_v51 = vmul.f32 0.17677669, %v3287_v48  ;;  %v2142_v55 = vsel %vm2111_vm12, %v4329_v46, -inf  ;;  %v1767_v48 = vmul.f32 %v4261_v8, %v4261_v8  ;;  %v1797_v49 = vsel %vm1775_vm11, %v1766_v44, 0.0 }
 0x8ed   : > { %v4337_v52 = vmul.f32 0.17677669, %v2067_v50  ;;  %v2136_v53 = vsel %vm2111_vm12, %v4331_v47, -inf  ;;  %v1768_v50 = vmul.f32 %v4264_v9, %v4264_v9 }
 0x8ee   : > { %2137 = vmax.xlane.f32.xlu0 %v2136_v53  ;;  %v2145_v57 = vsel %vm2111_vm12, %v4335_v51, -inf  ;;  %v1800_v53 = vsel %vm1775_vm11, %v1767_v48, 0.0 }
 0x8ef   : > { %v2139_v54 = vsel %vm2111_vm12, %v4337_v52, -inf }
 0x8f0   : > { %2140 = vmax.xlane.f32.xlu1 %v2139_v54  ;;  %v1769_v54 = vmul.f32 %v4273_v12, %v4273_v12 }
 0x8f1   : > { %v3290_v56 = vpop.f32.mrb[12].mxu1 }
 0x8f2   : > { %2143 = vmax.xlane.f32.xlu0 %v2142_v55  ;;  %v2080_v62 = vpop.f32.mrb[13].mxu1  ;;  %v4347_v63 = vmul.f32 0.17677669, %v3290_v56  ;;  %v1803_v55 = vsel %vm1775_vm11, %v1768_v50, 0.0  ;;  %v1770_v56 = vmul.f32 %v4276_v13, %v4276_v13 }
 0x8f3   : > { %v4349_v4 = vmul.f32 0.17677669, %v2080_v62  ;;  %v3291_v5 = vpop.f32.mrb[14].mxu1  ;;  %v1771_v62 = vmul.f32 %v4279_v14, %v4279_v14 }
 0x8f4   : > { %2146 = vmax.xlane.f32.xlu1 %v2145_v57  ;;  %v2083_v10 = vpop.f32.mrb[15].mxu1  ;;  %v4351_v11 = vmul.f32 0.17677669, %v3291_v5  ;;  %v2154_v27 = vsel %vm2111_vm12, %v4347_v63, -inf  ;;  %v1806_v57 = vsel %vm1775_vm11, %v1769_v54, 0.0  ;;  %v1809_v5 = vsel %vm1775_vm11, %v1770_v56, 0.0 }
 0x8f5   : > { %v4353_v18 = vmul.f32 0.17677669, %v2083_v10  ;;  %v2148_v23 = vsel %vm2111_vm12, %v4349_v4, -inf  ;;  %v1772_v10 = vmul.f32 %v4282_v17, %v4282_v17 }
 0x8f6   : > { %2149 = vmax.xlane.f32.xlu0 %v2148_v23  ;;  %v2157_v16 = vsel %vm2111_vm12, %v4351_v11, -inf  ;;  %v1812_v23 = vsel %vm1775_vm11, %v1771_v62, 0.0 }
 0x8f7   : > { %v2151_v26 = vsel %vm2111_vm12, %v4353_v18, -inf }
 0x8f8   : > { %2152 = vmax.xlane.f32.xlu1 %v2151_v26  ;;  %v1773_v26 = vmul.f32 %v4291_v24, %v4291_v24 }
 0x8fa   : > { %2155 = vmax.xlane.f32.xlu0 %v2154_v27  ;;  %v1815_v27 = vsel %vm1775_vm11, %v1772_v10, 0.0  ;;  %v1818_v42 = vsel %vm1775_vm11, %v1773_v26, 0.0 }
 0x8fc   : > { %2158 = vmax.xlane.f32.xlu1 %v2157_v16  ;;  %v4890_v16 = vmov 0.0  }
 0x8fd   : > { %3254 = vmatprep.subr.bf16.mxu0 %v4890_v16 }
 0x8fe   : > { %1777 = vadd.xlane.f32.xlu0 %v1776_v21 }
 0x900   : > { %1780 = vadd.xlane.f32.xlu1 %v1779_v30 }
 0x902   : > { %1783 = vadd.xlane.f32.xlu0 %v1782_v32 }
 0x904   : > { %1786 = vadd.xlane.f32.xlu1 %v1785_v35 }
 0x906   : > { %1789 = vadd.xlane.f32.xlu0 %v1788_v39 }
 0x908   : > { %1792 = vadd.xlane.f32.xlu1 %v1791_v43 }
 0x90a   : > { %1795 = vadd.xlane.f32.xlu0 %v1794_v45 }
 0x90c   : > { %1798 = vadd.xlane.f32.xlu1 %v1797_v49 }
 0x90e   : > { %1801 = vadd.xlane.f32.xlu0 %v1800_v53 }
 0x910   : > { %1804 = vadd.xlane.f32.xlu1 %v1803_v55 }
 0x912   : > { %1807 = vadd.xlane.f32.xlu0 %v1806_v57 }
 0x914   : > { %1810 = vadd.xlane.f32.xlu1 %v1809_v5 }
 0x916   : > { %1813 = vadd.xlane.f32.xlu0 %v1812_v23 }
 0x918   : > { %1816 = vadd.xlane.f32.xlu1 %v1815_v27 }
 0x91a   : > { %1819 = vadd.xlane.f32.xlu0 %v1818_v42 }
 0x96a   : > { %v4411_v21 = vpop.xlane.xlu1 %2119 }
 0x96b   : > { %v2162_v29 = vsub.f32 %v4299_v28, %v4411_v21  ;;  %v4415_v30 = vpop.xlane.xlu0 %2113 }
 0x96c   : > { %v2160_v31 = vsub.f32 %v4301_v15, %v4415_v30 }
 0x96d   : > { %v2180_v32 = vmul.f32 1.442695, %v2162_v29 }
 0x96e   : > { %v2176_v33 = vmul.f32 1.442695, %v2160_v31  ;;  %v4419_v35 = vpop.xlane.xlu1 %2122 }
 0x96f   : > { %3440 = vpow2.f32 %v2180_v32  ;;  %v2163_v37 = vsub.f32 %v4303_v19, %v4419_v35  ;;  %v4423_v61 = vpop.xlane.xlu0 %2116 }
 0x970   : > { %v2161_v39 = vsub.f32 %v4307_v22, %v4423_v61  ;;  %3442 = vpow2.f32 %v2176_v33 }
 0x971   : > { %v2182_v28 = vmul.f32 1.442695, %v2163_v37 }
 0x972   : > { %v2178_v41 = vmul.f32 1.442695, %v2161_v39 }
 0x973   : > { %3444 = vpow2.f32 %v2182_v28  ;;  %v4427_v43 = vpop.xlane.xlu0 %2125 }
 0x974   : > { %3446 = vpow2.f32 %v2178_v41  ;;  %v2164_v44 = vsub.f32 %v4315_v34, %v4427_v43 }
 0x975   : > { %v4429_v15 = vpop.xlane.xlu1 %2128 }
 0x976   : > { %v2165_v19 = vsub.f32 %v4319_v38, %v4429_v15  ;;  %v2184_v53 = vmul.f32 1.442695, %v2164_v44 }
 0x977   : > { %v4435_v45 = vpop.xlane.xlu0 %2131 }
 0x978   : > { %v2166_v22 = vsub.f32 %v4317_v36, %v4435_v45  ;;  %v2186_v49 = vmul.f32 1.442695, %v2165_v19 }
 0x979   : > { %v4439_v48 = vpop.eup %3440  ;;  %v4441_v50 = vpop.xlane.xlu1 %2134 }
 0x97a   : > { %v2188_v54 = vmul.f32 1.442695, %v2166_v22  ;;  %v2167_v55 = vsub.f32 %v4323_v40, %v4441_v50  ;;  %v2214_v34 = vsel %vm2111_vm12, %v4439_v48, 0.0  ;;  %v4447_v56 = vpop.eup %3442 }
 0x97b   : > { %v4449_v38 = vpop.xlane.xlu0 %2137  ;;  %2215 = vadd.xlane.f32.xlu0 %v2214_v34  ;;  %v2208_v23 = vsel %vm2111_vm12, %v4447_v56, 0.0 }
 0x97c   : > { %3448 = vpow2.f32 %v2188_v54  ;;  %v2190_v57 = vmul.f32 1.442695, %v2167_v55  ;;  %v2168_v62 = vsub.f32 %v4331_v47, %v4449_v38  ;;  %v1774_v47 = vmul.f32 %v4294_v25, %v4294_v25 }
 0x97d   : > { %v4451_v36 = vpop.eup %3444  ;;  %3450 = vpow2.f32 %v2186_v49  ;;  %v4455_v5 = vpop.xlane.xlu1 %2140 }
 0x97e   : > { %3452 = vpow2.f32 %v2184_v53  ;;  %v2169_v40 = vsub.f32 %v4337_v52, %v4455_v5  ;;  %v2217_v10 = vsel %vm2111_vm12, %v4451_v36, 0.0  ;;  %v4463_v26 = vpop.eup %3446  ;;  %v2192_v42 = vmul.f32 1.442695, %v2168_v62 }
 0x97f   : > { %v4465_v27 = vpop.xlane.xlu0 %2143  ;;  %2218 = vadd.xlane.f32.xlu1 %v2217_v10  ;;  %2209 = vadd.xlane.f32.xlu0 %v2208_v23  ;;  %3454 = vpow2.f32 %v2190_v57  ;;  %v2211_v32 = vsel %vm2111_vm12, %v4463_v26, 0.0  ;;  %v1821_v39 = vsel %vm1775_vm11, %v1774_v47, 0.0 }
 0x980   : > { %v2170_v52 = vsub.f32 %v4329_v46, %v4465_v27  ;;  %v2194_v29 = vmul.f32 1.442695, %v2169_v40  ;;  %3456 = vpow2.f32 %v2192_v42 }
 0x981   : > { %v4471_v20 = vpop.xlane.xlu1 %2146 }
 0x982   : > { %v2171_v31 = vsub.f32 %v4335_v51, %v4471_v20  ;;  %v2196_v28 = vmul.f32 1.442695, %v2170_v52  ;;  %3458 = vpow2.f32 %v2194_v29 }
 0x983   : > { %v4477_v33 = vpop.xlane.xlu0 %2149  ;;  %2212 = vadd.xlane.f32.xlu1 %v2211_v32 }
 0x984   : > { %v2172_v37 = vsub.f32 %v4349_v4, %v4477_v33  ;;  %v2198_v44 = vmul.f32 1.442695, %v2171_v31  ;;  %3460 = vpow2.f32 %v2196_v28 }
 0x985   : > { %v4482_v46 = vpop.xlane.xlu1 %2152 }
 0x986   : > { %v4484_v41 = vpop.eup %3448  ;;  %v2173_v51 = vsub.f32 %v4353_v18, %v4482_v46  ;;  %v2200_v53 = vmul.f32 1.442695, %v2172_v37  ;;  %v1880_v18 = vmul.f32 %v4217_v58, %v4217_v58  ;;  %3462 = vpow2.f32 %v2198_v44 }
 0x987   : > { %v4488_v19 = vpop.eup %3450  ;;  %v4490_v22 = vpop.xlane.xlu0 %2155  ;;  %1822 = vadd.xlane.f32.xlu1 %v1821_v39  ;;  %v2226_v4 = vsel %vm2111_vm12, %v4484_v41, 0.0 }
 0x988   : > { %v4494_v49 = vpop.eup %3452  ;;  %v2174_v54 = vsub.f32 %v4347_v63, %v4490_v22  ;;  %2227 = vadd.xlane.f32.xlu0 %v2226_v4  ;;  %v2202_v55 = vmul.f32 1.442695, %v2173_v51  ;;  %v2223_v40 = vsel %vm2111_vm12, %v4488_v19, 0.0  ;;  %3464 = vpow2.f32 %v2200_v53 }
 0x989   : > { %v4498_v34 = vpop.xlane.xlu1 %2158  ;;  %v4506_v10 = vpop.eup %3454  ;;  %v2220_v63 = vsel %vm2111_vm12, %v4494_v49, 0.0  ;;  %v1881_v52 = vsel %vm1775_vm11, %v1880_v18, 0.0 }
 0x98a   : > { %v2204_v57 = vmul.f32 1.442695, %v2174_v54  ;;  %v2175_v62 = vsub.f32 %v4351_v11, %v4498_v34  ;;  %3466 = vpow2.f32 %v2202_v55  ;;  %v2229_v11 = vsel %vm2111_vm12, %v4506_v10, 0.0  ;;  %v4513_v32 = vpop.eup %3456 }
 0x98b   : > { %2224 = vadd.xlane.f32.xlu1 %v2223_v40  ;;  %v1778_v23 = vpop.xlane.xlu0 %1777  ;;  %v2232_v51 = vsel %vm2111_vm12, %v4513_v32, 0.0 }
 0x98c   : > { %2221 = vadd.xlane.f32.xlu0 %v2220_v63  ;;  %v1824_v47 = vadd.f32 1e-12, %v1778_v23  ;;  %v2206_v42 = vmul.f32 1.442695, %v2175_v62  ;;  %3468 = vpow2.f32 %v2204_v57  ;;  %v4515_v39 = vpop.eup %3458 }
 0x98d   : > { %v1781_v29 = vpop.xlane.xlu1 %1780  ;;  %v2235_v54 = vsel %vm2111_vm12, %v4515_v39, 0.0 }
 0x98e   : > { %v1825_v31 = vadd.f32 1e-12, %v1781_v29  ;;  %3470 = vrsqrt.f32 %v1824_v47  ;;  %v4519_v53 = vpop.eup %3460 }
 0x98f   : > { %2230 = vadd.xlane.f32.xlu1 %v2229_v11  ;;  %v1784_v37 = vpop.xlane.xlu0 %1783  ;;  %v2238_v63 = vsel %vm2111_vm12, %v4519_v53, 0.0 }
 0x990   : > { %1882 = vadd.xlane.f32.xlu0 %v1881_v52  ;;  %3472 = vrsqrt.f32 %v1825_v31  ;;  %v1826_v28 = vadd.f32 1e-12, %v1784_v37  ;;  %v4523_v18 = vpop.eup %3462 }
 0x991   : > { %3474 = vpow2.f32 %v2206_v42  ;;  %v1787_v44 = vpop.xlane.xlu1 %1786  ;;  %v2241_v42 = vsel %vm2111_vm12, %v4523_v18, 0.0 }
 0x992   : > { %v1827_v4 = vadd.f32 1e-12, %v1787_v44  ;;  %3476 = vrsqrt.f32 %v1826_v28  ;;  %v4525_v40 = vpop.eup %3464 }
 0x993   : > { %2233 = vadd.xlane.f32.xlu1 %v2232_v51  ;;  %v1790_v55 = vpop.xlane.xlu0 %1789  ;;  %v2244_v28 = vsel %vm2111_vm12, %v4525_v40, 0.0 }
 0x994   : > { %2236 = vadd.xlane.f32.xlu0 %v2235_v54  ;;  %3478 = vrsqrt.f32 %v1827_v4  ;;  %v1828_v57 = vadd.f32 1e-12, %v1790_v55  ;;  %v4529_v47 = vpop.eup %3466 }
 0x995   : > { %v1793_v62 = vpop.xlane.xlu1 %1792  ;;  %v2247_v4 = vsel %vm2111_vm12, %v4529_v47, 0.0 }
 0x996   : > { %v1829_v23 = vadd.f32 1e-12, %v1793_v62  ;;  %3480 = vrsqrt.f32 %v1828_v57  ;;  %v4533_v52 = vpop.eup %3468 }
 0x997   : > { %2239 = vadd.xlane.f32.xlu1 %v2238_v63  ;;  %v1796_v29 = vpop.xlane.xlu0 %1795  ;;  %v2250_v16 = vsel %vm2111_vm12, %v4533_v52, 0.0 }
 0x998   : > { %2242 = vadd.xlane.f32.xlu0 %v2241_v42  ;;  %3482 = vrsqrt.f32 %v1829_v23  ;;  %v3471_v11 = vpop.eup %3470  ;;  %v1830_v55 = vadd.f32 1e-12, %v1796_v29 }
 0x999   : > { %v1799_v31 = vpop.xlane.xlu1 %1798  ;;  %v1856_v44 = vmul.f32 %v3471_v11, %v4220_v59 }
 0x99a   : > { %v3473_v37 = vpop.eup %3472  ;;  %v1831_v62 = vadd.f32 1e-12, %v1799_v31  ;;  %3484 = vrsqrt.f32 %v1830_v55 }
 0x99b   : > { %v4538_v51 = vpop.eup %3474  ;;  %2245 = vadd.xlane.f32.xlu1 %v2244_v28  ;;  %v1857_v54 = vmul.f32 %v3473_v37, %v4223_v60  ;;  %v1802_v29 = vpop.xlane.xlu0 %1801 }
 0x99c   : > { %v3477_v57 = vpop.eup %3476  ;;  %2248 = vadd.xlane.f32.xlu0 %v2247_v4  ;;  %v2253_v11 = vsel %vm2111_vm12, %v4538_v51, 0.0  ;;  %3486 = vrsqrt.f32 %v1831_v62  ;;  %v1832_v60 = vadd.f32 1e-12, %v1802_v29 }
 0x99d   : > { %v1872_v63 = vpack.c.bf16 %v1857_v54, %v1856_v44  ;;  %v1858_v23 = vmul.f32 %v3477_v57, %v4237_v0  ;;  %v4920_v44 = vmov 0.0   ;;  %v1805_v54 = vpop.xlane.xlu1 %1804 }
 0x99e   : > { %v3479_v42 = vpop.eup %3478  ;;  %3488 = vrsqrt.f32 %v1832_v60  ;;  %3270 = vmatprep.mubr.msk.bf16.mxu0 %vm3732_vm14, %v4920_v44 }
 0x99f   : > { %2251 = vadd.xlane.f32.xlu1 %v2250_v16  ;;  %v1892_v28 = vsel %vm1775_vm11, %v1872_v63, 0  ;;  %v1859_v37 = vmul.f32 %v3479_v42, %v4240_v1  ;;  %v1833_v16 = vadd.f32 1e-12, %v1805_v54  ;;  %v1808_v63 = vpop.xlane.xlu0 %1807 }
 0x9a0   : > { %2254 = vadd.xlane.f32.xlu0 %v2253_v11  ;;  %3255 = vmatpush3.bf16.xpose.msra.mxu0 %v1892_v28  ;;  %v3481_v31 = vpop.eup %3480  ;;  %v1834_v28 = vadd.f32 1e-12, %v1808_v63 }
 0x9a1   : > { %3256 = vmatprep.subr.bf16.mxu0 %v4920_v44  ;;  %v1873_v4 = vpack.c.bf16 %v1859_v37, %v1858_v23  ;;  %v1860_v59 = vmul.f32 %v3481_v31, %v4243_v2  ;;  %3490 = vrsqrt.f32 %v1833_v16  ;;  %v1811_v11 = vpop.xlane.xlu1 %1810 }
 0x9a2   : > { %v3483_v57 = vpop.eup %3482  ;;  %v1835_v37 = vadd.f32 1e-12, %v1811_v11  ;;  %3492 = vrsqrt.f32 %v1834_v28 }
 0x9a3   : > { %v1895_v0 = vsel %vm1775_vm11, %v1873_v4, 0  ;;  %v1861_v55 = vmul.f32 %v3483_v57, %v4246_v3  ;;  %v1814_v57 = vpop.xlane.xlu0 %1813 }
 0x9a4   : > { %v3485_v62 = vpop.eup %3484  ;;  %3494 = vrsqrt.f32 %v1835_v37  ;;  %v1836_v16 = vadd.f32 1e-12, %v1814_v57 }
 0x9a5   : > { %v1874_v42 = vpack.c.bf16 %v1861_v55, %v1860_v59  ;;  %v1862_v4 = vmul.f32 %v3485_v62, %v4255_v6  ;;  %v1817_v54 = vpop.xlane.xlu1 %1816 }
 0x9a6   : > { %v3487_v23 = vpop.eup %3486  ;;  %v1837_v55 = vadd.f32 1e-12, %v1817_v54  ;;  %3496 = vrsqrt.f32 %v1836_v16 }
 0x9a7   : > { %v1898_v29 = vsel %vm1775_vm11, %v1874_v42, 0  ;;  %v1863_v31 = vmul.f32 %v3487_v23, %v4258_v7 }
 0x9a8   : > { %3257 = vmatpush3.bf16.xpose.msra.mxu0 %v1895_v0  ;;  %v3489_v60 = vpop.eup %3488  ;;  %3498 = vrsqrt.f32 %v1837_v55 }
 0x9a9   : > { %3258 = vmatprep.subr.bf16.mxu0 %v4920_v44  ;;  %v1875_v0 = vpack.c.bf16 %v1863_v31, %v1862_v4  ;;  %v1864_v62 = vmul.f32 %v3489_v60, %v4261_v8 }
 0x9ab   : > { %v3491_v59 = vpop.eup %3490  ;;  %v1901_v63 = vsel %vm1775_vm11, %v1875_v0, 0 }
 0x9ac   : > { %v1865_v42 = vmul.f32 %v3491_v59, %v4264_v9  ;;  %v3493_v11 = vpop.eup %3492 }
 0x9ae   : > { %v1876_v23 = vpack.c.bf16 %v1865_v42, %v1864_v62  ;;  %v3495_v28 = vpop.eup %3494 }
 0x9af   : > { %v1867_v4 = vmul.f32 %v3495_v28, %v4276_v13 }
 0x9b0   : > { %3259 = vmatpush3.bf16.xpose.msra.mxu0 %v1898_v29  ;;  %v1904_v37 = vsel %vm1775_vm11, %v1876_v23, 0  ;;  %v1866_v29 = vmul.f32 %v3493_v11, %v4273_v12  ;;  %v3497_v31 = vpop.eup %3496 }
 0x9b1   : > { %3260 = vmatprep.subr.bf16.mxu0 %v4920_v44  ;;  %v1868_v59 = vmul.f32 %v3497_v31, %v4279_v14 }
 0x9b2   : > { %v1877_v60 = vpack.c.bf16 %v1867_v4, %v1866_v29  ;;  %v3499_v0 = vpop.eup %3498 }
 0x9b3   : > { %v1869_v57 = vmul.f32 %v3499_v0, %v4282_v17 }
 0x9b4   : > { %v1907_v54 = vsel %vm1775_vm11, %v1877_v60, 0 }
 0x9b5   : > { %v1878_v16 = vpack.c.bf16 %v1869_v57, %v1868_v59 }
 0x9b7   : > { %v1910_v55 = vsel %vm1775_vm11, %v1878_v16, 0 }
 0x9b8   : > { %3261 = vmatpush3.bf16.xpose.msra.mxu0 %v1901_v63  ;;  %v1820_v63 = vpop.xlane.xlu0 %1819 }
 0x9b9   : > { %3262 = vmatprep.subr.bf16.mxu0 %v4920_v44  ;;  %v1838_v28 = vadd.f32 1e-12, %v1820_v63 }
 0x9c0   : > { %3263 = vmatpush3.bf16.xpose.msra.mxu0 %v1904_v37 }
 0x9c1   : > { %3264 = vmatprep.subr.bf16.mxu0 %v4920_v44 }
 0x9c8   : > { %3265 = vmatpush3.bf16.xpose.msra.mxu0 %v1907_v54 }
 0x9c9   : > { %3266 = vmatprep.subr.bf16.mxu0 %v4920_v44 }
 0x9d0   : > { %3267 = vmatpush3.bf16.xpose.msra.mxu0 %v1910_v55 }
 0x9d1   : > { %3268 = vmatprep.subr.bf16.mxu0 %v4920_v44 }
 0xa08   : > { %v2216_v62 = vpop.xlane.xlu0 %2215 }
 0xa09   : > { %3500 = vlog2.f32 %v2216_v62 }
 0xa0a   : > { %3502 = vrcp.f32 %v2216_v62 }
 0xa0c   : > { %v2219_v42 = vpop.xlane.xlu1 %2218  ;;  %v2210_v11 = vpop.xlane.xlu0 %2209 }
 0xa0d   : > { %3504 = vrcp.f32 %v2219_v42 }
 0xa0e   : > { %3506 = vlog2.f32 %v2219_v42 }
 0xa0f   : > { %3508 = vrcp.f32 %v2210_v11 }
 0xa10   : > { %3510 = vlog2.f32 %v2210_v11  ;;  %v2213_v23 = vpop.xlane.xlu1 %2212 }
 0xa11   : > { %3512 = vrcp.f32 %v2213_v23 }
 0xa12   : > { %3514 = vlog2.f32 %v2213_v23 }
 0xa13   : > { %v3501_v37 = vpop.eup %3500  ;;  %3516 = vrsqrt.f32 %v1838_v28 }
 0xa14   : > { %v1823_v29 = vpop.xlane.xlu1 %1822  ;;  %v2441_v4 = vmul.f32 0.6931472, %v3501_v37  ;;  %v3503_v60 = vpop.eup %3502 }
 0xa15   : > { %v1839_v31 = vadd.f32 1e-12, %v1823_v29  ;;  %v2228_v44 = vpop.xlane.xlu0 %2227 }
 0xa16   : > { %3518 = vrcp.f32 %v2228_v44  ;;  %v4575_v54 = vadd.f32 %v2441_v4, %v4411_v21 }
 0xa17   : > { %v3505_v0 = vpop.eup %3504  ;;  %3520 = vrsqrt.f32 %v1839_v31  ;;  %v2274_v31 = vmul.f32 %v3503_v60, %v4439_v48 }
 0xa18   : > { %v3507_v59 = vpop.eup %3506  ;;  %3522 = vlog2.f32 %v2228_v44  ;;  %v2225_v57 = vpop.xlane.xlu1 %2224  ;;  %v2275_v11 = vmul.f32 %v3505_v0, %v4451_v36 }
 0xa19   : > { %v3509_v16 = vpop.eup %3508  ;;  %v2443_v55 = vmul.f32 0.6931472, %v3507_v59  ;;  %3524 = vrcp.f32 %v2225_v57  ;;  %v2222_v63 = vpop.xlane.xlu0 %2221 }
 0xa1a   : > { %v3511_v62 = vpop.eup %3510  ;;  %3526 = vlog2.f32 %v2225_v57  ;;  %v2272_v29 = vmul.f32 %v3509_v16, %v4447_v56 }
 0xa1b   : > { %v3513_v42 = vpop.eup %3512  ;;  %v4579_v23 = vadd.f32 %v2443_v55, %v4419_v35  ;;  %v2437_v28 = vmul.f32 0.6931472, %v3511_v62  ;;  %3528 = vrcp.f32 %v2222_v63  ;;  %v2289_v55 = vpack.c.bf16 %v2275_v11, %v2274_v31 }
 0xa1c   : > { %v3515_v21 = vpop.eup %3514  ;;  %3530 = vlog2.f32 %v2222_v63  ;;  %v2231_v37 = vpop.xlane.xlu1 %2230  ;;  %v2273_v4 = vmul.f32 %v3513_v42, %v4463_v26 }
 0xa1d   : > { %v4585_v44 = vadd.f32 %v2437_v28, %v4415_v30  ;;  %v2439_v59 = vmul.f32 0.6931472, %v3515_v21  ;;  %3532 = vrcp.f32 %v2231_v37  ;;  %v1883_v36 = vpop.xlane.xlu0 %1882  ;;  %v3517_v57 = vpop.eup %3516 }
 0xa1e   : > { %3534 = vlog2.f32 %v2231_v37  ;;  %v1884_v35 = vadd.f32 1e-12, %v1883_v36  ;;  %v2288_v0 = vpack.c.bf16 %v2273_v4, %v2272_v29  ;;  %v1870_v60 = vmul.f32 %v3517_v57, %v4291_v24 }
 0xa1f   : > { %v4588_v63 = vadd.f32 %v2439_v59, %v4423_v61 }
 0xa20   : > { %v3519_v62 = vpop.eup %3518  ;;  %3536 = vrsqrt.f32 %v1884_v35  ;;  %v2234_v56 = vpop.xlane.xlu1 %2233  ;;  %3294 = vmatprep.mubr.msk.bf16.mxu1 %vm2111_vm12, %v2288_v0 }
 0xa21   : > { %v3521_v48 = vpop.eup %3520  ;;  %3538 = vrcp.f32 %v2234_v56  ;;  %3295 = vmatmul.mubr.msk.bf16.vlgmr.msra.gmra.mrb[16].mxu1 %vm2111_vm12, %v2289_v55  ;;  %v2237_v30 = vpop.xlane.xlu0 %2236 }
 0xa22   : > { %v3523_v26 = vpop.eup %3522  ;;  %3540 = vlog2.f32 %v2234_v56  ;;  %v1871_v16 = vmul.f32 %v3521_v48, %v4294_v25 }
 0xa23   : > { %v3525_v42 = vpop.eup %3524  ;;  %v2449_v11 = vmul.f32 0.6931472, %v3523_v26  ;;  %3542 = vrcp.f32 %v2237_v30 }
 0xa24   : > { %v3527_v61 = vpop.eup %3526  ;;  %3544 = vlog2.f32 %v2237_v30  ;;  %v2240_v28 = vpop.xlane.xlu1 %2239  ;;  %v1879_v21 = vpack.c.bf16 %v1871_v16, %v1870_v60  ;;  %v2277_v37 = vmul.f32 %v3525_v42, %v4488_v19  ;;  %v2278_v30 = vmul.f32 %v3519_v62, %v4484_v41 }
 0xa25   : > { %v3529_v29 = vpop.eup %3528  ;;  %v4596_v4 = vadd.f32 %v2449_v11, %v4435_v45  ;;  %v2447_v31 = vmul.f32 0.6931472, %v3527_v61  ;;  %3546 = vrcp.f32 %v2240_v28  ;;  %v2243_v59 = vpop.xlane.xlu0 %2242 }
 0xa26   : > { %v3531_v36 = vpop.eup %3530  ;;  %3548 = vlog2.f32 %v2240_v28  ;;  %v1913_v35 = vsel %vm1775_vm11, %v1879_v21, 0  ;;  %v2276_v0 = vmul.f32 %v3529_v29, %v4494_v49 }
 0xa27   : > { %v3533_v57 = vpop.eup %3532  ;;  %v4601_v55 = vadd.f32 %v2447_v31, %v4429_v15  ;;  %v2445_v56 = vmul.f32 0.6931472, %v3531_v36  ;;  %3550 = vrcp.f32 %v2243_v59  ;;  %3269 = vmatpush3.bf16.xpose.msra.mxu0 %v1913_v35 }
 0xa28   : > { %v3535_v19 = vpop.eup %3534  ;;  %3552 = vlog2.f32 %v2243_v59  ;;  %v2246_v45 = vpop.xlane.xlu1 %2245  ;;  %v2290_v48 = vpack.c.bf16 %v2277_v37, %v2276_v0  ;;  %v2279_v26 = vmul.f32 %v3533_v57, %v4506_v10 }
 0xa29   : > { %v4606_v60 = vadd.f32 %v2445_v56, %v4427_v43  ;;  %v2451_v16 = vmul.f32 0.6931472, %v3535_v19  ;;  %3554 = vrcp.f32 %v2246_v45  ;;  %v2249_v49 = vpop.xlane.xlu0 %2248 }
 0xa2a   : > { %v3537_v42 = vpop.eup %3536  ;;  %3556 = vlog2.f32 %v2246_v45  ;;  %3298 = vmatprep.mubr.msk.bf16.mxu1 %vm2111_vm12, %v2290_v48  ;;  %v2291_v15 = vpack.c.bf16 %v2279_v26, %v2278_v30 }
 0xa2b   : > { %v3539_v11 = vpop.eup %3538  ;;  %v4610_v61 = vadd.f32 %v2451_v16, %v4441_v50  ;;  %3558 = vrcp.f32 %v2249_v49  ;;  %v1886_v41 = vmul.f32 %v3537_v42, %v4217_v58 }
 0xa2c   : > { %v3541_v62 = vpop.eup %3540  ;;  %3560 = vlog2.f32 %v2249_v49  ;;  %v2252_v10 = vpop.xlane.xlu1 %2251  ;;  %3299 = vmatmul.mubr.msk.bf16.gmra.mrb[20].mxu1 %vm2111_vm12, %v2291_v15  ;;  %v2280_v43 = vmul.f32 %v3539_v11, %v4513_v32 }
 0xa2d   : > { %v3543_v28 = vpop.eup %3542  ;;  %v2453_v21 = vmul.f32 0.6931472, %v3541_v62  ;;  %3562 = vrcp.f32 %v2252_v10  ;;  %v2255_v37 = vpop.xlane.xlu0 %2254  ;;  %v1887_v29 = vpack.c.bf16 %v1886_v41, %v1886_v41 }
 0xa2e   : > { %v3545_v31 = vpop.eup %3544  ;;  %3564 = vlog2.f32 %v2252_v10  ;;  %v2281_v50 = vmul.f32 %v3543_v28, %v4515_v39 }
 0xa2f   : > { %v3547_v59 = vpop.eup %3546  ;;  %v4617_v36 = vadd.f32 %v2453_v21, %v4449_v38  ;;  %v2455_v35 = vmul.f32 0.6931472, %v3545_v31  ;;  %3566 = vrcp.f32 %v2255_v37  ;;  %3271 = vmatmul.mubr.msk.bf16.vlgmr.msra.gmra.mrb[0].mxu0 %vm1775_vm11, %v1887_v29 }
 0xa30   : > { %v3549_v0 = vpop.eup %3548  ;;  %3568 = vlog2.f32 %v2255_v37  ;;  %v2292_v32 = vpack.c.bf16 %v2281_v50, %v2280_v43  ;;  %v2282_v57 = vmul.f32 %v3547_v59, %v4519_v53 }
 0xa31   : > { %v3551_v56 = vpop.eup %3550  ;;  %v4622_v19 = vadd.f32 %v2455_v35, %v4455_v5  ;;  %v2457_v45 = vmul.f32 0.6931472, %v3549_v0 }
 0xa32   : > { %v3553_v48 = vpop.eup %3552  ;;  %3302 = vmatprep.mubr.msk.bf16.mxu1 %vm2111_vm12, %v2292_v32  ;;  %v2283_v38 = vmul.f32 %v3551_v56, %v4523_v18 }
 0xa33   : > { %v3555_v39 = vpop.eup %3554  ;;  %v4627_v30 = vadd.f32 %v2457_v45, %v4465_v27  ;;  %v2459_v26 = vmul.f32 0.6931472, %v3553_v48 }
 0xa34   : > { %v3557_v16 = vpop.eup %3556  ;;  %v2293_v49 = vpack.c.bf16 %v2283_v38, %v2282_v57  ;;  %v2284_v42 = vmul.f32 %v3555_v39, %v4525_v40 }
 0xa35   : > { %v3559_v53 = vpop.eup %3558  ;;  %v4631_v15 = vadd.f32 %v2459_v26, %v4471_v20  ;;  %v2461_v5 = vmul.f32 0.6931472, %v3557_v16 }
 0xa36   : > { %v3561_v11 = vpop.eup %3560  ;;  %3303 = vmatmul.mubr.msk.bf16.gmra.mrb[24].mxu1 %vm2111_vm12, %v2293_v49  ;;  %v2285_v41 = vmul.f32 %v3559_v53, %v4529_v47 }
 0xa37   : > { %v3563_v18 = vpop.eup %3562  ;;  %v4636_v62 = vadd.f32 %v2461_v5, %v4477_v33  ;;  %v2463_v27 = vmul.f32 0.6931472, %v3561_v11 }
 0xa38   : > { %v3565_v10 = vpop.eup %3564  ;;  %v2294_v43 = vpack.c.bf16 %v2285_v41, %v2284_v42  ;;  %v2286_v40 = vmul.f32 %v3563_v18, %v4533_v52 }
 0xa39   : > { %v3567_v28 = vpop.eup %3566  ;;  %v4640_v20 = vadd.f32 %v2463_v27, %v4482_v46  ;;  %v2465_v21 = vmul.f32 0.6931472, %v3565_v10 }
 0xa3a   : > { %v3569_v37 = vpop.eup %3568  ;;  %3306 = vmatprep.mubr.msk.bf16.mxu1 %vm2111_vm12, %v2294_v43  ;;  %v2287_v33 = vmul.f32 %v3567_v28, %v4538_v51  ;;  %v3733_v43 = vmov (!%p2942_p10), 0.0  }
 0xa3b   : > { %v4645_v47 = vadd.f32 %v2465_v21, %v4490_v22  ;;  %v2467_v29 = vmul.f32 0.6931472, %v3569_v37  ;;  %2488 = vst.msk [vmem:[#allocation7] sm:$0x1] (!%p2942_p10), %vm2487_vm15, %v3733_v43  ;;  %2489 = vst.msk [vmem:[#allocation8] sm:$0x1] (!%p2942_p10), %vm2487_vm15, %v3733_v43 }
 0xa3c   : > { %v2295_v31 = vpack.c.bf16 %v2287_v33, %v2286_v40 }
 0xa3d   : > { %v4648_v52 = vadd.f32 %v2467_v29, %v4498_v34 }
 0xa3e   : > { %3307 = vmatmul.mubr.msk.bf16.gmra.mrb[28].mxu1 %vm2111_vm12, %v2295_v31 }
 0xaf4   : > { %v3296_v46 = vpop.f32.mrb[16].mxu1 }
 0xaf5   : > { %2422 = vst.msk [vmem:[%s3918_s19 + $0x10] sm:$0xff] %vm1775_vm11, %v3296_v46  ;;  %v2357_v50 = vpop.f32.mrb[17].mxu1 }
 0xaf6   : > { %2420 = vst.msk [vmem:[%s3918_s19] sm:$0xff] %vm1775_vm11, %v2357_v50  ;;  %v3297_v51 = vpop.f32.mrb[18].mxu1 }
 0xaf7   : > { %2423 = vst.msk [vmem:[%s3918_s19 + $0x18] sm:$0xff] %vm1775_vm11, %v3297_v51  ;;  %v2360_v22 = vpop.f32.mrb[19].mxu1 }
 0xaf8   : > { %2421 = vst.msk [vmem:[%s3918_s19 + $0x8] sm:$0xff] %vm1775_vm11, %v2360_v22 }
 0xaff   : > { %v3300_v59 = vpop.f32.mrb[20].mxu1 }
 0xb00   : > { %2426 = vst.msk [vmem:[%s3918_s19 + $0x30] sm:$0xff] %vm1775_vm11, %v3300_v59  ;;  %v2373_v34 = vpop.f32.mrb[21].mxu1 }
 0xb01   : > { %2424 = vst.msk [vmem:[%s3918_s19 + $0x20] sm:$0xff] %vm1775_vm11, %v2373_v34  ;;  %v3301_v35 = vpop.f32.mrb[22].mxu1 }
 0xb02   : > { %2427 = vst.msk [vmem:[%s3918_s19 + $0x38] sm:$0xff] %vm1775_vm11, %v3301_v35  ;;  %v1949_v0 = vpop.f32.mrb[0].mxu0  ;;  %v2376_v32 = vpop.f32.mrb[23].mxu1 }
 0xb03   : > { %v1955_v57 = vrot.slane %v1949_v0, 4  ;;  %2425 = vst.msk [vmem:[%s3918_s19 + $0x28] sm:$0xff] %vm1775_vm11, %v2376_v32  ;;  %v3272_v56 = vpop.f32.mrb[1].mxu0 }
 0xb04   : > { %v1952_v45 = vpop.f32.mrb[2].mxu0 }
 0xb05   : > { %v1956_v48 = vmax.f32 %v1949_v0, %v1955_v57  ;;  %v3273_v38 = vpop.f32.mrb[3].mxu0 }
 0xb07   : > { %v1957_v39 = vrot.slane %v1956_v48, 2 }
 0xb09   : > { %v1958_v26 = vmax.f32 %v1956_v48, %v1957_v39  ;;  %v3304_v16 = vpop.f32.mrb[24].mxu1 }
 0xb0a   : > { %2430 = vst.msk [vmem:[%s3918_s19 + $0x50] sm:$0xff] %vm1775_vm11, %v3304_v16  ;;  %v2389_v49 = vpop.f32.mrb[25].mxu1 }
 0xb0b   : > { %v1959_v42 = vrot.slane %v1958_v26, 1  ;;  %2428 = vst.msk [vmem:[%s3918_s19 + $0x40] sm:$0xff] %vm1775_vm11, %v2389_v49  ;;  %v3305_v53 = vpop.f32.mrb[26].mxu1 }
 0xb0c   : > { %2431 = vst.msk [vmem:[%s3918_s19 + $0x58] sm:$0xff] %vm1775_vm11, %v3305_v53  ;;  %v2392_v5 = vpop.f32.mrb[27].mxu1 }
 0xb0d   : > { %v1960_v11 = vmax.f32 %v1958_v26, %v1959_v42  ;;  %2429 = vst.msk [vmem:[%s3918_s19 + $0x48] sm:$0xff] %vm1775_vm11, %v2392_v5 }
 0xb0f   : > { %1961 = vst [vmem:[%s3924_s12] sm:$0x1] %v1960_v11  ;;  %2486 = sbr.rel (%p2942_p10) target bundleno = 2838 (0xb16), region = 76 }
 0xb11   : > { %v3308_v41 = vpop.f32.mrb[28].mxu1 }
 0xb12   : > { %2434 = vst.msk [vmem:[%s3918_s19 + $0x70] sm:$0xff] %vm1775_vm11, %v3308_v41  ;;  %v2405_v18 = vpop.f32.mrb[29].mxu1 }
 0xb13   : > { %2432 = vst.msk [vmem:[%s3918_s19 + $0x60] sm:$0xff] %vm1775_vm11, %v2405_v18  ;;  %v3309_v27 = vpop.f32.mrb[30].mxu1 }
 0xb14   : > { %2435 = vst.msk [vmem:[%s3918_s19 + $0x78] sm:$0xff] %vm1775_vm11, %v3309_v27  ;;  %v2408_v10 = vpop.f32.mrb[31].mxu1 }
 0xb15   : > { %2433 = vst.msk [vmem:[%s3918_s19 + $0x68] sm:$0xff] %vm1775_vm11, %v2408_v10 }
 0xb16 PF: > { %v4921_v40 = vld [vmem:[#allocation27_spill] sm:$0xff]  ;;  %v4922_v21 = vld [vmem:[#allocation29_spill] sm:$0xff]  ;;  %v4923_v33 = vld [vmem:[#allocation28_spill] sm:$0xff]  ;;  %v2493_v31 = vsub.f32 %v3297_v51, %v4240_v1  ;;  %v2494_v0 = vsub.f32 %v2373_v34, %v4243_v2  ;;  %v2495_v57 = vsub.f32 %v2376_v32, %v4246_v3  ;;  %v2498_v11 = vsub.f32 %v2389_v49, %v4261_v8  ;;  %p2943_p11 = scmp.ne.s32.totalorder %s3704_s24, 1 }
 0xb17   : > { %v2490_v28 = vsub.f32 %v2357_v50, %v4921_v40  ;;  %v2492_v37 = vsub.f32 %v3296_v46, %v4922_v21  ;;  %v2491_v29 = vsub.f32 %v2360_v22, %v4923_v33  ;;  %v2496_v46 = vsub.f32 %v3300_v59, %v4255_v6  ;;  %2639 = vst.msk [vmem:[%s4870_s8] sm:$0xff] (!%p2943_p11), %vm1775_vm11, %v4217_v58 }
 0xb18   : > { %v2510_v38 = vmul.f32 %v2493_v31, %v2493_v31  ;;  %v2497_v50 = vsub.f32 %v3301_v35, %v4258_v7  ;;  %v2511_v51 = vmul.f32 %v2494_v0, %v2494_v0  ;;  %v2512_v3 = vmul.f32 %v2495_v57, %v2495_v57 }
 0xb19   : > { %v2507_v56 = vmul.f32 %v2490_v28, %v2490_v28  ;;  %v2509_v45 = vmul.f32 %v2492_v37, %v2492_v37  ;;  %v2508_v48 = vmul.f32 %v2491_v29, %v2491_v29  ;;  %v2513_v22 = vmul.f32 %v2496_v46, %v2496_v46 }
 0xb1a   : > { %v2532_v2 = vsel %vm1775_vm11, %v2510_v38, 0.0  ;;  %v2514_v34 = vmul.f32 %v2497_v50, %v2497_v50  ;;  %v2535_v32 = vsel %vm1775_vm11, %v2511_v51, 0.0  ;;  %v2538_v42 = vsel %vm1775_vm11, %v2512_v3, 0.0 }
 0xb1b   : > { %v2523_v39 = vsel %vm1775_vm11, %v2507_v56, 0.0  ;;  %v2529_v26 = vsel %vm1775_vm11, %v2509_v45, 0.0  ;;  %v2526_v1 = vsel %vm1775_vm11, %v2508_v48, 0.0  ;;  %v2499_v6 = vsub.f32 %v2392_v5, %v4264_v9 }
 0xb1c   : > { %2524 = vadd.xlane.f32.xlu0 %v2523_v39  ;;  %2530 = vadd.xlane.f32.xlu1 %v2529_v26  ;;  %v2541_v7 = vsel %vm1775_vm11, %v2513_v22, 0.0  ;;  %v2544_v59 = vsel %vm1775_vm11, %v2514_v34, 0.0  ;;  %v2515_v35 = vmul.f32 %v2498_v11, %v2498_v11  ;;  %v2500_v40 = vsub.f32 %v3304_v16, %v4273_v12 }
 0xb1d   : > { %v2516_v43 = vmul.f32 %v2499_v6, %v2499_v6  ;;  %v2501_v28 = vsub.f32 %v3305_v53, %v4276_v13  ;;  %v2502_v21 = vsub.f32 %v2405_v18, %v4279_v14  ;;  %v2503_v8 = vsub.f32 %v2408_v10, %v4282_v17 }
 0xb1e   : > { %v2547_v9 = vsel %vm1775_vm11, %v2515_v35, 0.0  ;;  %v2517_v5 = vmul.f32 %v2500_v40, %v2500_v40  ;;  %v2504_v33 = vsub.f32 %v3308_v41, %v4291_v24  ;;  %v2505_v12 = vsub.f32 %v3309_v27, %v4294_v25 }
 0xb1f   : > { %v2550_v49 = vsel %vm1775_vm11, %v2516_v43, 0.0  ;;  %v2518_v37 = vmul.f32 %v2501_v28, %v2501_v28  ;;  %v2596_v13 = vmul.f32 %v4585_v44, %v4585_v44  ;;  %v2597_v14 = vmul.f32 %v4588_v63, %v4588_v63 }
 0xb20   : > { %2527 = vadd.xlane.f32.xlu0 %v2526_v1  ;;  %2533 = vadd.xlane.f32.xlu1 %v2532_v2  ;;  %v2553_v17 = vsel %vm1775_vm11, %v2517_v5, 0.0  ;;  %v2519_v53 = vmul.f32 %v2502_v21, %v2502_v21  ;;  %v2520_v18 = vmul.f32 %v2503_v8, %v2503_v8  ;;  %v2598_v10 = vmul.f32 %v4575_v54, %v4575_v54 }
 0xb21   : > { %v2556_v16 = vsel %vm1775_vm11, %v2518_v37, 0.0  ;;  %v2612_v24 = vadd.f32 %v2597_v14, %v2596_v13  ;;  %v2599_v25 = vmul.f32 %v4579_v23, %v4579_v23  ;;  %v2521_v27 = vmul.f32 %v2504_v33, %v2504_v33 }
 0xb22   : > { %v2559_v44 = vsel %vm1775_vm11, %v2519_v53, 0.0  ;;  %v2562_v63 = vsel %vm1775_vm11, %v2520_v18, 0.0  ;;  %v2522_v29 = vmul.f32 %v2505_v12, %v2505_v12  ;;  %v2600_v31 = vmul.f32 %v4606_v60, %v4606_v60 }
 0xb23   : > { %v2613_v41 = vadd.f32 %v2612_v24, %v2598_v10  ;;  %v2601_v54 = vmul.f32 %v4601_v55, %v4601_v55  ;;  %v2565_v56 = vsel %vm1775_vm11, %v2521_v27, 0.0  ;;  %v2602_v45 = vmul.f32 %v4596_v4, %v4596_v4 }
 0xb24   : > { %2536 = vadd.xlane.f32.xlu0 %v2535_v32  ;;  %2539 = vadd.xlane.f32.xlu1 %v2538_v42  ;;  %v2568_v23 = vsel %vm1775_vm11, %v2522_v29, 0.0  ;;  %v2603_v60 = vmul.f32 %v4610_v61, %v4610_v61  ;;  %v2604_v39 = vmul.f32 %v4617_v36, %v4617_v36  ;;  %v2605_v55 = vmul.f32 %v4622_v19, %v4622_v19 }
 0xb25   : > { %v2614_v0 = vadd.f32 %v2613_v41, %v2599_v25  ;;  %v2606_v50 = vmul.f32 %v4627_v30, %v4627_v30  ;;  %v2607_v4 = vmul.f32 %v4631_v15, %v4631_v15  ;;  %v2608_v61 = vmul.f32 %v4636_v62, %v4636_v62  ;;  %v2595_v62 = vld [vmem:[#allocation8] sm:$0x1] }
 0xb26   : > { %v2609_v36 = vmul.f32 %v4640_v20, %v4640_v20  ;;  %v2610_v19 = vmul.f32 %v4645_v47, %v4645_v47  ;;  %v2611_v30 = vmul.f32 %v4648_v52, %v4648_v52  ;;  %vm2593_vm0 = vcmask 0  }
 0xb27   : > { %v2615_v57 = vadd.f32 %v2614_v0, %v2600_v31 }
 0xb28   : > { %2542 = vadd.xlane.f32.xlu0 %v2541_v7  ;;  %2545 = vadd.xlane.f32.xlu1 %v2544_v59 }
 0xb29   : > { %v2616_v48 = vadd.f32 %v2615_v57, %v2601_v54 }
 0xb2b   : > { %v2617_v38 = vadd.f32 %v2616_v48, %v2602_v45 }
 0xb2c   : > { %2548 = vadd.xlane.f32.xlu0 %v2547_v9  ;;  %2551 = vadd.xlane.f32.xlu1 %v2550_v49 }
 0xb2d   : > { %v2618_v26 = vadd.f32 %v2617_v38, %v2603_v60  ;;  %v2506_v60 = vld [vmem:[#allocation7] sm:$0x1] }
 0xb2f   : > { %v2619_v46 = vadd.f32 %v2618_v26, %v2604_v39 }
 0xb30   : > { %2554 = vadd.xlane.f32.xlu0 %v2553_v17  ;;  %2557 = vadd.xlane.f32.xlu1 %v2556_v16 }
 0xb31   : > { %v2620_v1 = vadd.f32 %v2619_v46, %v2605_v55 }
 0xb33   : > { %v2621_v2 = vadd.f32 %v2620_v1, %v2606_v50 }
 0xb34   : > { %2560 = vadd.xlane.f32.xlu0 %v2559_v44  ;;  %2563 = vadd.xlane.f32.xlu1 %v2562_v63 }
 0xb35   : > { %v2622_v51 = vadd.f32 %v2621_v2, %v2607_v4 }
 0xb37   : > { %v2623_v3 = vadd.f32 %v2622_v51, %v2608_v61 }
 0xb38   : > { %2566 = vadd.xlane.f32.xlu0 %v2565_v56  ;;  %2569 = vadd.xlane.f32.xlu1 %v2568_v23 }
 0xb39   : > { %v2624_v22 = vadd.f32 %v2623_v3, %v2609_v36 }
 0xb3b   : > { %v2625_v34 = vadd.f32 %v2624_v22, %v2610_v19 }
 0xb3d   : > { %v2626_v32 = vadd.f32 %v2625_v34, %v2611_v30 }
 0xb3f   : > { %v2627_v42 = vrot.slane %v2626_v32, 4 }
 0xb41   : > { %v2628_v15 = vadd.f32 %v2627_v42, %v2626_v32 }
 0xb43   : > { %v2629_v11 = vrot.slane %v2628_v15, 2 }
 0xb45   : > { %v2630_v6 = vadd.f32 %v2629_v11, %v2628_v15 }
 0xb47   : > { %v2631_v7 = vrot.slane %v2630_v6, 1 }
 0xb49   : > { %v2632_v59 = vadd.f32 %v2631_v7, %v2630_v6 }
 0xb4b   : > { %v2633_v35 = vadd.f32 %v2632_v59, %v2595_v62 }
 0xb4d   : > { %2634 = vst.msk [vmem:[#allocation8] sm:$0x1] %vm2593_vm0, %v2633_v35 }
 0xb54   : > { %v2643_v55 = vld [vmem:[#allocation8] sm:$0x1] (!%p2943_p11) }
 0xb55   : > { %v2644_v50 = vmul.f32 (!%p2943_p11), 0.00390625, %v2643_v55 }
 0xb57   : > { %2645 = vst.msk [vmem:[#allocation13] sm:$0x1] (!%p2943_p11), %vm2593_vm0, %v2644_v50 }
 0xba9   : > { %v2525_v20 = vpop.xlane.xlu0 %2524  ;;  %v2531_v43 = vpop.xlane.xlu1 %2530 }
 0xbad   : > { %v2528_v47 = vpop.xlane.xlu0 %2527  ;;  %v2534_v40 = vpop.xlane.xlu1 %2533 }
 0xbae   : > { %v2571_v28 = vadd.f32 %v2528_v47, %v2525_v20 }
 0xbb0   : > { %v2572_v21 = vadd.f32 %v2571_v28, %v2531_v43 }
 0xbb1   : > { %v2537_v52 = vpop.xlane.xlu0 %2536  ;;  %v2540_v8 = vpop.xlane.xlu1 %2539 }
 0xbb2   : > { %v2573_v9 = vadd.f32 %v2572_v21, %v2534_v40 }
 0xbb4   : > { %v2574_v49 = vadd.f32 %v2573_v9, %v2537_v52 }
 0xbb5   : > { %v2543_v5 = vpop.xlane.xlu0 %2542  ;;  %v2546_v37 = vpop.xlane.xlu1 %2545 }
 0xbb6   : > { %v2575_v33 = vadd.f32 %v2574_v49, %v2540_v8 }
 0xbb8   : > { %v2576_v12 = vadd.f32 %v2575_v33, %v2543_v5 }
 0xbb9   : > { %v2549_v13 = vpop.xlane.xlu0 %2548  ;;  %v2552_v14 = vpop.xlane.xlu1 %2551 }
 0xbba   : > { %v2577_v17 = vadd.f32 %v2576_v12, %v2546_v37 }
 0xbbc   : > { %v2578_v16 = vadd.f32 %v2577_v17, %v2549_v13 }
 0xbbd   : > { %v2555_v53 = vpop.xlane.xlu0 %2554  ;;  %v2558_v18 = vpop.xlane.xlu1 %2557 }
 0xbbe   : > { %v2579_v10 = vadd.f32 %v2578_v16, %v2552_v14 }
 0xbc0   : > { %v2580_v24 = vadd.f32 %v2579_v10, %v2555_v53 }
 0xbc1   : > { %v2561_v25 = vpop.xlane.xlu0 %2560  ;;  %v2564_v41 = vpop.xlane.xlu1 %2563 }
 0xbc2   : > { %v2581_v44 = vadd.f32 %v2580_v24, %v2558_v18 }
 0xbc4   : > { %v2582_v63 = vadd.f32 %v2581_v44, %v2561_v25 }
 0xbc5   : > { %v2567_v27 = vpop.xlane.xlu0 %2566  ;;  %v2570_v31 = vpop.xlane.xlu1 %2569 }
 0xbc6   : > { %v2583_v29 = vadd.f32 %v2582_v63, %v2564_v41 }
 0xbc8   : > { %v2584_v0 = vadd.f32 %v2583_v29, %v2567_v27 }
 0xbca   : > { %v2585_v54 = vadd.f32 %v2584_v0, %v2570_v31 }
 0xbcc   : > { %v2586_v57 = vrot.slane %v2585_v54, 4 }
 0xbce   : > { %v2587_v56 = vadd.f32 %v2586_v57, %v2585_v54 }
 0xbd0   : > { %v2588_v23 = vrot.slane %v2587_v56, 2 }
 0xbd2   : > { %v2589_v45 = vadd.f32 %v2588_v23, %v2587_v56 }
 0xbd4   : > { %v2590_v48 = vrot.slane %v2589_v45, 1  ;;  %2638 = sbr.rel (%p2943_p11) target bundleno = 3045 (0xbe5), region = 80 }
 0xbd6   : > { %v2591_v38 = vadd.f32 %v2590_v48, %v2589_v45 }
 0xbd8   : > { %v2592_v39 = vadd.f32 %v2591_v38, %v2506_v60 }
 0xbda   : > { %2594 = vst.msk [vmem:[#allocation7] sm:$0x1] %vm2593_vm0, %v2592_v39 }
 0xbe1   : > { %v2640_v26 = vld [vmem:[#allocation7] sm:$0x1] }
 0xbe2   : > { %v2641_v46 = vmul.f32 0.00012207031, %v2640_v26 }
 0xbe4   : > { %2642 = vst.msk [vmem:[#allocation11] sm:$0x1] %vm2593_vm0, %v2641_v46 }
 0xbe5 PF: > { %s3734_s25 = smov [#allocation11]   ;;  %s4925_s18 = sld [smem:[#allocation32_spill]] }
 0xbe6   : > { %s2682_s17 = sshll.u32 %s3734_s25, 4  ;;  %s2683_s17 = int_to_ptr.vmem [resolvable:$true] %s2682_s17 }
 0xbe7   : > { %s3570_s27 = scalar_lea.vmem %s2683_s17, 16  ;;  %s3576_s13 = scalar_lea.vmem %s2683_s17, 32 }
 0xbe8   : > { %p3571_p12 = scmp.ne.s32.totalorder %s2683_s17, %s3570_s27  ;;  %p3577_p1 = scmp.lt.s32.totalorder %s2683_s17, %s2683_s17 }
 0xbe9   : > { %p3578_p4 = scmp.lt.s32.totalorder %s3576_s13, %s3570_s27 }
 0xbea   : > { %p3572_p13 = pnand %p3571_p12, %p3849_p2 }
 0xbeb   : > { %s4763_s15 = scalar_lea.hbm %s4925_s18, %s3879_s30  ;;  %p3579_p5 = por %p3578_p4, %p3577_p1 }
 0xbec   : > { %p3573_p0 = pneg %p3572_p13 }
 0xbee   : > { %p3580_p6 = pnand %p3579_p5, %p3573_p0 }
 0xbf0   : > { %3583 = shalt.err (!%p3580_p6)
}
 0xbf1   : > { %s4926_s20 = sld [smem:[#allocation33_spill]] }
 0xbf7   : > { %s3584_s29 = scalar_lea.hbm %s4926_s20, 16 }
 0xbf8   : > { %p3585_p7 = scmp.ne.s32.totalorder %s4926_s20, %s3584_s29  ;;  %p3590_p11 = scmp.lt.u32.totalorder %s3584_s29, %s4926_s20 }
 0xbfa   : > { %p3586_p9 = pnand %p3585_p7, %p3849_p2 }
 0xbfc   : > { %p3587_p10 = pneg %p3586_p9 }
 0xbfe   : > { %p3592_p12 = pnand %p3590_p11, %p3587_p10 }
 0xc00   : > { %3595 = shalt.err (!%p3592_p12)
}
 0xc01   : > { %3314 = dma.vmem_to_hbm [thread:$0]  (%p3849_p2), %s2683_s17, 16, %s4926_s20, [#allocation12]  }
 0xc02   : > { %s2667_s23 = sshll.u32 %s3924_s12, 4  ;;  %s3735_s25 = smov [#allocation13]   ;;  %s4784_s23 = int_to_ptr.vmem [resolvable:$true] %s2667_s23 }
 0xc03   : > { %s4786_s19 = sshll.u32 %s3735_s25, 4  ;;  %s4928_s16 = sand.u32 1, %s3696_s22   ;;  %s2694_s19 = int_to_ptr.vmem [resolvable:$true] %s4786_s19 }
 0xc04   : > { %s2647_s27 = scalar_lea.sflag [#allocation10], %s4928_s16  ;;  %s3596_s13 = scalar_lea.vmem %s4784_s23, 16 }
 0xc05   : > { %p3597_p13 = scmp.ne.s32.totalorder %s4784_s23, %s3596_s13  ;;  %s3736_s26 = smov [#allocation9]  }
 0xc06   : > { %s3600_s28 = sshll.u32 %s3736_s26, 4  ;;  %s3601_s28 = int_to_ptr.vmem [resolvable:$false] %s3600_s28 }
 0xc07   : > { %p3598_p0 = pnand %p3597_p13, %p3860_p3  ;;  %s3602_s17 = scalar_lea.vmem %s3601_s28, 32 }
 0xc08   : > { %p3603_p4 = scmp.lt.s32.totalorder %s4784_s23, %s3601_s28  ;;  %p3604_p5 = scmp.lt.s32.totalorder %s3602_s17, %s3596_s13 }
 0xc09   : > { %p3599_p1 = pneg %p3598_p0 }
 0xc0a   : > { %p3605_p6 = por %p3604_p5, %p3603_p4 }
 0xc0c   : > { %p3606_p7 = pnand %p3605_p6, %p3599_p1 }
 0xc0e   : > { %3609 = shalt.err (!%p3606_p7)
}
 0xc0f   : > { %s3610_s12 = scalar_lea.hbm %s4763_s15, 16  ;;  %s3614_s11 = scalar_lea.hbm %s4925_s18, 32 }
 0xc10   : > { %p3611_p9 = scmp.ne.s32.totalorder %s4763_s15, %s3610_s12  ;;  %p3615_p12 = scmp.lt.u32.totalorder %s4763_s15, %s4925_s18 }
 0xc11   : > { %p3616_p13 = scmp.lt.u32.totalorder %s3614_s11, %s3610_s12  ;;  %p3618_p1 = scmp.lt.u32.totalorder %s3610_s12, %s4763_s15 }
 0xc12   : > { %p3612_p10 = pnand %p3611_p9, %p3860_p3 }
 0xc13   : > { %p3617_p0 = por %p3616_p13, %p3615_p12 }
 0xc14   : > { %p3613_p11 = pneg %p3612_p10 }
 0xc15   : > { %p3619_p4 = por %p3618_p1, %p3617_p0 }
 0xc17   : > { %p3620_p5 = pnand %p3619_p4, %p3613_p11 }
 0xc19   : > { %3623 = shalt.err (!%p3620_p5)
}
 0xc1a   : > { %3312 = dma.vmem_to_hbm [thread:$0]  (%p3860_p3), %s4784_s23, 16, %s4763_s15, %s2647_s27  }
 0xc1b   : > { %s3624_s9 = scalar_lea.vmem %s2694_s19, 16  ;;  %s3630_s14 = scalar_lea.vmem %s2694_s19, 32 }
 0xc1c   : > { %p3625_p6 = scmp.ne.s32.totalorder %s2694_s19, %s3624_s9  ;;  %p3631_p10 = scmp.lt.s32.totalorder %s2694_s19, %s2694_s19 }
 0xc1d   : > { %p3632_p12 = scmp.lt.s32.totalorder %s3630_s14, %s3624_s9 }
 0xc1e   : > { %p3626_p7 = pnand %p3625_p6, %p3849_p2 }
 0xc1f   : > { %p3633_p13 = por %p3632_p12, %p3631_p10 }
 0xc20   : > { %p3627_p9 = pneg %p3626_p7 }
 0xc22   : > { %p3634_p0 = pnand %p3633_p13, %p3627_p9 }
 0xc24   : > { %3637 = shalt.err (!%p3634_p0)
}
 0xc25   : > { %s4929_s1 = sld [smem:[#allocation34_spill]] }
 0xc2b   : > { %s3638_s13 = scalar_lea.hbm %s4929_s1, 16 }
 0xc2c   : > { %p3639_p3 = scmp.ne.s32.totalorder %s4929_s1, %s3638_s13  ;;  %p3644_p4 = scmp.lt.u32.totalorder %s3638_s13, %s4929_s1 }
 0xc2e   : > { %p3640_p11 = pnand %p3639_p3, %p3849_p2 }
 0xc30   : > { %p3641_p1 = pneg %p3640_p11 }
 0xc32   : > { %p3646_p5 = pnand %p3644_p4, %p3641_p1 }
 0xc34   : > { %3649 = shalt.err (!%p3646_p5)
}
 0xc35   : > { %3316 = dma.vmem_to_hbm [thread:$0]  (%p3849_p2), %s2694_s19, 16, %s4929_s1, [#allocation12]  }
 0xc36   : > { %3683 = dma.done.wait (%p3849_p2), [#allocation12], 32  }
 0xc37   : > { %3685 = vsyncadd (%p3849_p2), [#allocation12], 4294967264 }
 0xc38 PF: > { %s4930_s12 = sld [smem:[#allocation20_spill]]  ;;  %s4931_s29 = sld [smem:[#allocation16_spill]] }
 0xc3e   : > { %p3330_p6 = scmp.ge.s32.totalorder %s4930_s12, 2  ;;  %s2716_s11 = sand.u32 1, %s4931_s29  }
 0xc3f   : > { %s2717_s30 = scalar_lea.sflag [#allocation10], %s2716_s11 }
 0xc40   : > { %p3323_p7 = pnand %p3330_p6, %p3871_p8 }
 0xc42   : > { %3687 = dma.done.wait (!%p3323_p7), %s2717_s30, 16  }
 0xc43   : > { %3689 = vsyncadd (!%p3323_p7), %s2717_s30, 4294967280  ;;  %s27_s28 = sadd.s32 1, %s4930_s12   ;;  %s4933_s19 = sld [smem:[#allocation17_spill]] }
 0xc44   : > { %p24_p9 = scmp.ge.s32.totalorder %s27_s28, 8   ;;  %s4934_s23 = sld [smem:[#allocation25_spill]] }
 0xc45   : > { %s4935_s24 = sld [smem:[#allocation18_spill]]  ;;  %s4936_s25 = sld [smem:[#allocation19_spill]] }
 0xc46   : > { %s4937_s26 = sld [smem:[#allocation22_spill]]  ;;  %s4938_s27 = sld [smem:[#allocation24_spill]] }
 0xc47   : > { %s4939_s21 = smov %s3696_s22  ;;  %26 = sbr.rel (!%p24_p9) target bundleno = 12 (0xc), region = 163 }
 0xc49   : > { %s4940_s22 = smov %s4933_s19 }
 0xc4e   :  { %2729 = vsyncpa [#allocation10], 1 }
 0xc4f   :  { %2731 = vsyncpa [#allocation10 + $0x1], 1 }
 0xc50   :  { %2732 = vsyncpa [#allocation12], 1 }

</bundles_post_ra>
